<compile_context>
chip_gen: v7x
topology: tpu7x:2x2x1
jax: 0.10.0
libtpu: 0.0.40
codegen_flags: <defaults>
</compile_context>

<pallas_src>
import numpy as np
import jax
import jax.numpy as jnp
from jax.experimental import pallas as pl
from jax.experimental.pallas import tpu as pltpu


# ----------------------------------------------------------------------------
# Fused 3-layer Conv1d(k=3,pad=1) + BN(eval) + ReLU kernel
# ----------------------------------------------------------------------------
def _fused_cnn_kernel(x_ref,
                      w1_ref, s1_ref, b1_ref,
                      w2_ref, s2_ref, b2_ref,
                      w3_ref, s3_ref, b3_ref,
                      o_ref):
    # x_ref : (TB, L, Cin)      bf16 activations for TB batch rows
    # wN_ref: (3, CinN, CoutN)  bf16 conv weights; tap k multiplies x[l-1+k]
    # sN/bN : (1, CoutN)        f32 folded BN scale / bias (incl. conv bias)
    # o_ref : (TB, 96, L)       f32, PyTorch NCL layout
    TB, L, Cin = x_ref.shape
    R = TB * L

    # Sequence position of every flattened row; rows at a sequence start/end
    # must not pick up rows belonging to the neighbouring batch element.
    lpos = jax.lax.broadcasted_iota(jnp.int32, (R, 1), 0) % L
    not_first = lpos != 0
    not_last = lpos != (L - 1)

    def shift_down(a):          # out[r] = a[r-1], out[0] = 0
        return jnp.concatenate([jnp.zeros_like(a[:1]), a[:-1]], axis=0)

    def shift_up(a):            # out[r] = a[r+1], out[R-1] = 0
        return jnp.concatenate([a[1:], jnp.zeros_like(a[:1])], axis=0)

    def conv_bn_relu(h, w_ref, s_ref, b_ref):
        # h: (R, C) bf16  ->  (R, Cout) f32
        h_prev = jnp.where(not_first, shift_down(h), 0).astype(h.dtype)
        h_next = jnp.where(not_last, shift_up(h), 0).astype(h.dtype)
        acc = jnp.dot(h_prev, w_ref[0], preferred_element_type=jnp.float32)
        acc = acc + jnp.dot(h, w_ref[1], preferred_element_type=jnp.float32)
        acc = acc + jnp.dot(h_next, w_ref[2], preferred_element_type=jnp.float32)
        y = acc * s_ref[...] + b_ref[...]          # BN(eval) + conv bias, f32
        return jnp.maximum(y, 0.0)                 # ReLU (Dropout = identity)

    h = x_ref[...].reshape(R, Cin)                                   # bf16
    h = conv_bn_relu(h, w1_ref, s1_ref, b1_ref).astype(jnp.bfloat16)
    h = conv_bn_relu(h, w2_ref, s2_ref, b2_ref).astype(jnp.bfloat16)
    y = conv_bn_relu(h, w3_ref, s3_ref, b3_ref)                      # (R, 128) f32

    # Emit NCL directly: (TB, L, 128) -> (TB, 128, L) on the XLU, then drop
    # the 96 -> 128 channel padding before the store.
    c_out = o_ref.shape[1]
    y_ncl = jnp.swapaxes(y.reshape(TB, L, -1), 1, 2)
    o_ref[...] = y_ncl[:, :c_out, :].astype(o_ref.dtype)


def cnn_forward(x_nlc, params, target_rows=512):
    """Full module forward. x_nlc: (B, L, C_in) f32 -> (B, 96, L) f32."""
    B, L, Cin = x_nlc.shape
    (w1, s1, b1), (w2, s2, b2), (w3, s3, b3) = params
    C1, C2, C3 = w1.shape[-1], w2.shape[-1], w3.shape[-1]
    C3p = ((C3 + 127) // 128) * 128        # lane-dense final matmul N (96->128)

    # Weights stay per-tap: (3, Cin, Cout), bf16 for the MXU.
    w1b = w1.astype(jnp.bfloat16)
    w2b = w2.astype(jnp.bfloat16)
    w3b = jnp.pad(w3, ((0, 0), (0, 0), (0, C3p - C3))).astype(jnp.bfloat16)
    s1r = s1.reshape(1, C1).astype(jnp.float32)
    b1r = b1.reshape(1, C1).astype(jnp.float32)
    s2r = s2.reshape(1, C2).astype(jnp.float32)
    b2r = b2.reshape(1, C2).astype(jnp.float32)
    # Padded output channels keep scale = bias = 0 -> ReLU leaves exact zeros.
    s3r = jnp.pad(s3, (0, C3p - C3)).reshape(1, C3p).astype(jnp.float32)
    b3r = jnp.pad(b3, (0, C3p - C3)).reshape(1, C3p).astype(jnp.float32)

    # Batch tile: fill the MXU M dim (~target_rows rows/step) with no divisor
    # constraint on B (B is padded, grid is ceil-div), and keep >= 2 grid
    # steps whenever B >= 2 so both v7x TensorCores get work.
    tb_cap = max(1, target_rows // max(L, 1))
    TB = max(1, min(tb_cap, (B + 1) // 2))
    grid_b = -(-B // TB)
    B_pad = grid_b * TB

    x_bf16 = x_nlc.astype(jnp.bfloat16)
    if B_pad != B:
        x_bf16 = jnp.pad(x_bf16, ((0, B_pad - B), (0, 0), (0, 0)))

    vec2 = lambda i: (0, 0)
    full3 = lambda i: (0, 0, 0)
    out = pl.pallas_call(
        _fused_cnn_kernel,
        out_shape=jax.ShapeDtypeStruct((B_pad, C3, L), jnp.float32),
        grid_spec=pltpu.PrefetchScalarGridSpec(
            num_scalar_prefetch=0,
            grid=(grid_b,),
            in_specs=[
                pl.BlockSpec((TB, L, Cin), lambda i: (i, 0, 0)),
                pl.BlockSpec((3, Cin, C1), full3),
                pl.BlockSpec((1, C1), vec2),
                pl.BlockSpec((1, C1), vec2),
                pl.BlockSpec((3, C1, C2), full3),
                pl.BlockSpec((1, C2), vec2),
                pl.BlockSpec((1, C2), vec2),
                pl.BlockSpec((3, C2, C3p), full3),
                pl.BlockSpec((1, C3p), vec2),
                pl.BlockSpec((1, C3p), vec2),
            ],
            out_specs=pl.BlockSpec((TB, C3, L), lambda i: (i, 0, 0)),
        ),
        compiler_params=pltpu.CompilerParams(
            dimension_semantics=("parallel",),
            vmem_limit_bytes=32 * 1024 * 1024,
        ),
    )(x_bf16, w1b, s1r, b1r, w2b, s2r, b2r, w3b, s3r, b3r)

    return out[:B] if B_pad != B else out


# ----------------------------------------------------------------------------
# Parameter construction (deterministic, eval-mode BN folding)
# ----------------------------------------------------------------------------
def make_params(key, input_channels):
    """Returns list of (w_kio, folded_scale, folded_bias) per conv block."""
    dims = [input_channels, 384, 192, 96]  # hardcoded in the PyTorch module
    params = []
    eps = 1e-5
    for i in range(3):
        cin, cout = dims[i], dims[i + 1]
        key, k_w, k_b, k_g, k_be, k_m, k_v = jax.random.split(key, 7)
        # conv weight in (K, Cin, Cout) = PyTorch (Cout, Cin, K).transpose(2,1,0)
        w_kio = 0.05 * jax.random.normal(k_w, (3, cin, cout), jnp.float32)
        conv_b = 0.05 * jax.random.normal(k_b, (cout,), jnp.float32)
        gamma = 1.0 + 0.1 * jax.random.normal(k_g, (cout,), jnp.float32)
        beta = 0.1 * jax.random.normal(k_be, (cout,), jnp.float32)
        run_mean = 0.1 * jax.random.normal(k_m, (cout,), jnp.float32)
        run_var = jnp.abs(1.0 + 0.1 * jax.random.normal(k_v, (cout,), jnp.float32))
        # Fold BN (eval) + conv bias:  y = scale * conv(x) + bias_eff
        scale = gamma / jnp.sqrt(run_var + eps)
        bias_eff = (conv_b - run_mean) * scale + beta
        params.append((w_kio, scale, bias_eff))
    return params


# ----------------------------------------------------------------------------
# Pure-JAX reference (independent f32 conv implementation) for verification
# ----------------------------------------------------------------------------
def reference_forward(x_nlc, params):
    h = jnp.transpose(x_nlc, (0, 2, 1))  # (B, C, L)
    for (w_kio, scale, bias) in params:
        w_oik = jnp.transpose(w_kio, (2, 1, 0))  # (Cout, Cin, K)
        h = jax.lax.conv_general_dilated(
            h, w_oik, window_strides=(1,), padding=((1, 1),),
            dimension_numbers=("NCH", "OIH", "NCH"))
        h = h * scale[None, :, None] + bias[None, :, None]
        h = jnp.maximum(h, 0.0)
    return h  # (B, 96, L)


if __name__ == "__main__":
    key = jax.random.PRNGKey(0)
    k_x, k_p = jax.random.split(key)

    B, L, C_IN = 2, 16, 128          # small shapes; module input is (B, L, C_in)
    x = jax.random.normal(k_x, (B, L, C_IN), jnp.float32)
    params = make_params(k_p, C_IN)

    out = jax.block_until_ready(cnn_forward(x, params))
    ref = jax.block_until_ready(reference_forward(x, params))

    assert out.shape == (B, 96, L), out.shape
    # Tolerance reflects bf16 matmul operands (f32 accumulation / f32 BN).
    np.testing.assert_allclose(np.asarray(out), np.asarray(ref), rtol=2e-2, atol=2e-2)
    print("KERNEL_OK")
</pallas_src>

<mosaic_0001>
module attributes {stable_mosaic.version = 11 : i64} {
  func.func @_fused_cnn_kernel(%arg0: i32, %arg1: memref<1x16x128xbf16, #tpu.memory_space<vmem>>, %arg2: memref<3x128x384xbf16, #tpu.memory_space<vmem>>, %arg3: memref<1x384xf32, #tpu.memory_space<vmem>>, %arg4: memref<1x384xf32, #tpu.memory_space<vmem>>, %arg5: memref<3x384x192xbf16, #tpu.memory_space<vmem>>, %arg6: memref<1x192xf32, #tpu.memory_space<vmem>>, %arg7: memref<1x192xf32, #tpu.memory_space<vmem>>, %arg8: memref<3x192x128xbf16, #tpu.memory_space<vmem>>, %arg9: memref<1x128xf32, #tpu.memory_space<vmem>>, %arg10: memref<1x128xf32, #tpu.memory_space<vmem>>, %arg11: memref<1x96x16xf32, #tpu.memory_space<vmem>>) attributes {dimension_semantics = [#tpu.dimension_semantics<parallel>], iteration_bounds = array<i64: 2>, scalar_prefetch = 0 : i64, scratch_operands = 0 : i64, tpu.core_type = #tpu.core_type<tc>, window_params = [{transform_indices = @transform_0, window_bounds = array<i64: 1, 16, 128>}, {pipeline_mode = #tpu.pipeline_mode<synchronous>, transform_indices = @transform_1, window_bounds = array<i64: 3, 128, 384>}, {pipeline_mode = #tpu.pipeline_mode<synchronous>, transform_indices = @transform_2, window_bounds = array<i64: 1, 384>}, {pipeline_mode = #tpu.pipeline_mode<synchronous>, transform_indices = @transform_3, window_bounds = array<i64: 1, 384>}, {pipeline_mode = #tpu.pipeline_mode<synchronous>, transform_indices = @transform_4, window_bounds = array<i64: 3, 384, 192>}, {pipeline_mode = #tpu.pipeline_mode<synchronous>, transform_indices = @transform_5, window_bounds = array<i64: 1, 192>}, {pipeline_mode = #tpu.pipeline_mode<synchronous>, transform_indices = @transform_6, window_bounds = array<i64: 1, 192>}, {pipeline_mode = #tpu.pipeline_mode<synchronous>, transform_indices = @transform_7, window_bounds = array<i64: 3, 192, 128>}, {pipeline_mode = #tpu.pipeline_mode<synchronous>, transform_indices = @transform_8, window_bounds = array<i64: 1, 128>}, {pipeline_mode = #tpu.pipeline_mode<synchronous>, transform_indices = @transform_9, window_bounds = array<i64: 1, 128>}, {transform_indices = @transform_10, window_bounds = array<i64: 1, 96, 16>}]} {
    %0 = tpu.iota {dimensions = array<i32: 0>} : vector<16x1xi32>
    %c16_i32 = arith.constant 16 : i32
    %c0_i32 = arith.constant 0 : i32
    %1 = arith.cmpi eq, %c16_i32, %c0_i32 : i32
    %c1_i32 = arith.constant 1 : i32
    %2 = arith.select %1, %c1_i32, %c16_i32 : i32
    %3 = vector.broadcast %2 : i32 to vector<16x1xi32>
    %4 = arith.remsi %0, %3 : vector<16x1xi32>
    %c0_i32_0 = arith.constant 0 : i32
    %5 = vector.broadcast %c0_i32_0 : i32 to vector<16x1xi32>
    %6 = arith.cmpi ne, %4, %5 : vector<16x1xi32>
    %c0_i32_1 = arith.constant 0 : i32
    %7 = vector.broadcast %c0_i32_1 : i32 to vector<16x1xi32>
    %8 = arith.cmpi slt, %4, %7 : vector<16x1xi32>
    %c0_i32_2 = arith.constant 0 : i32
    %9 = arith.cmpi slt, %2, %c0_i32_2 : i32
    %10 = vector.broadcast %9 : i1 to vector<16x1xi1>
    %11 = vector.broadcast %10 : vector<16x1xi1> to vector<16x1xi1>
    %12 = arith.xori %8, %11 : vector<16x1xi1>
    %13 = arith.andi %12, %6 : vector<16x1xi1>
    %14 = vector.broadcast %2 : i32 to vector<16x1xi32>
    %15 = arith.addi %4, %14 : vector<16x1xi32>
    %16 = arith.select %13, %15, %4 : vector<16x1xi1>, vector<16x1xi32>
    %c0_i32_3 = arith.constant 0 : i32
    %17 = vector.broadcast %c0_i32_3 : i32 to vector<16x1xi32>
    %18 = arith.cmpi ne, %16, %17 : vector<16x1xi32>
    %c15_i32 = arith.constant 15 : i32
    %19 = vector.broadcast %c15_i32 : i32 to vector<16x1xi32>
    %20 = arith.cmpi ne, %16, %19 : vector<16x1xi32>
    %c0 = arith.constant 0 : index
    %c0_4 = arith.constant 0 : index
    %c0_5 = arith.constant 0 : index
    %21 = vector.load %arg1[%c0, %c0_4, %c0_5] : memref<1x16x128xbf16, #tpu.memory_space<vmem>>, vector<1x16x128xbf16>
    %22 = vector.shape_cast %21 : vector<1x16x128xbf16> to vector<16x128xbf16>
    %cst = arith.constant 0.000000e+00 : bf16
    %23 = vector.broadcast %cst : bf16 to vector<1x128xbf16>
    %24 = vector.extract_strided_slice %22 {offsets = [0, 0], sizes = [15, 128], strides = [1, 1]} : vector<16x128xbf16> to vector<15x128xbf16>
    %25 = tpu.concatenate %23, %24 in 0 : vector<1x128xbf16>, vector<15x128xbf16> -> vector<16x128xbf16>
    %c0_i32_6 = arith.constant 0 : i32
    %26 = arith.sitofp %c0_i32_6 : i32 to bf16
    %27 = vector.shape_cast %18 : vector<16x1xi1> to vector<16x1xi1>
    %28 = vector.broadcast %27 : vector<16x1xi1> to vector<16x128xi1>
    %29 = vector.broadcast %26 : bf16 to vector<16x128xbf16>
    %30 = arith.select %28, %25, %29 : vector<16x128xi1>, vector<16x128xbf16>
    %31 = vector.extract_strided_slice %22 {offsets = [1, 0], sizes = [15, 128], strides = [1, 1]} : vector<16x128xbf16> to vector<15x128xbf16>
    %cst_7 = arith.constant 0.000000e+00 : bf16
    %32 = vector.broadcast %cst_7 : bf16 to vector<1x128xbf16>
    %33 = tpu.concatenate %31, %32 in 0 : vector<15x128xbf16>, vector<1x128xbf16> -> vector<16x128xbf16>
    %c0_i32_8 = arith.constant 0 : i32
    %34 = arith.sitofp %c0_i32_8 : i32 to bf16
    %35 = vector.shape_cast %20 : vector<16x1xi1> to vector<16x1xi1>
    %36 = vector.broadcast %35 : vector<16x1xi1> to vector<16x128xi1>
    %37 = vector.broadcast %34 : bf16 to vector<16x128xbf16>
    %38 = arith.select %36, %33, %37 : vector<16x128xi1>, vector<16x128xbf16>
    %c0_9 = arith.constant 0 : index
    %c0_10 = arith.constant 0 : index
    %c0_11 = arith.constant 0 : index
    %39 = vector.load %arg2[%c0_9, %c0_10, %c0_11] : memref<3x128x384xbf16, #tpu.memory_space<vmem>>, vector<1x128x384xbf16>
    %40 = vector.shape_cast %39 : vector<1x128x384xbf16> to vector<128x384xbf16>
    %cst_12 = arith.constant dense<0.000000e+00> : vector<16x384xf32>
    %41 = tpu.matmul %30, %40, %cst_12 {dimension_numbers = #tpu.dot_dimension_numbers<[1], [0], [0], [1], [0, 0, 1, 1], [], []>} : vector<16x128xbf16>, vector<128x384xbf16>, vector<16x384xf32> -> vector<16x384xf32>
    %c1 = arith.constant 1 : index
    %c0_13 = arith.constant 0 : index
    %c0_14 = arith.constant 0 : index
    %42 = vector.load %arg2[%c1, %c0_13, %c0_14] : memref<3x128x384xbf16, #tpu.memory_space<vmem>>, vector<1x128x384xbf16>
    %43 = vector.shape_cast %42 : vector<1x128x384xbf16> to vector<128x384xbf16>
    %cst_15 = arith.constant dense<0.000000e+00> : vector<16x384xf32>
    %44 = tpu.matmul %22, %43, %cst_15 {dimension_numbers = #tpu.dot_dimension_numbers<[1], [0], [0], [1], [0, 0, 1, 1], [], []>} : vector<16x128xbf16>, vector<128x384xbf16>, vector<16x384xf32> -> vector<16x384xf32>
    %45 = arith.addf %41, %44 : vector<16x384xf32>
    %c2 = arith.constant 2 : index
    %c0_16 = arith.constant 0 : index
    %c0_17 = arith.constant 0 : index
    %46 = vector.load %arg2[%c2, %c0_16, %c0_17] : memref<3x128x384xbf16, #tpu.memory_space<vmem>>, vector<1x128x384xbf16>
    %47 = vector.shape_cast %46 : vector<1x128x384xbf16> to vector<128x384xbf16>
    %cst_18 = arith.constant dense<0.000000e+00> : vector<16x384xf32>
    %48 = tpu.matmul %38, %47, %cst_18 {dimension_numbers = #tpu.dot_dimension_numbers<[1], [0], [0], [1], [0, 0, 1, 1], [], []>} : vector<16x128xbf16>, vector<128x384xbf16>, vector<16x384xf32> -> vector<16x384xf32>
    %49 = arith.addf %45, %48 : vector<16x384xf32>
    %c0_19 = arith.constant 0 : index
    %c0_20 = arith.constant 0 : index
    %50 = vector.load %arg3[%c0_19, %c0_20] : memref<1x384xf32, #tpu.memory_space<vmem>>, vector<1x384xf32>
    %51 = vector.broadcast %50 : vector<1x384xf32> to vector<16x384xf32>
    %52 = arith.mulf %49, %51 : vector<16x384xf32>
    %c0_21 = arith.constant 0 : index
    %c0_22 = arith.constant 0 : index
    %53 = vector.load %arg4[%c0_21, %c0_22] : memref<1x384xf32, #tpu.memory_space<vmem>>, vector<1x384xf32>
    %54 = vector.broadcast %53 : vector<1x384xf32> to vector<16x384xf32>
    %55 = arith.addf %52, %54 : vector<16x384xf32>
    %cst_23 = arith.constant 0.000000e+00 : f32
    %56 = vector.broadcast %cst_23 : f32 to vector<16x384xf32>
    %57 = arith.maximumf %55, %56 : vector<16x384xf32>
    %58 = arith.truncf %57 : vector<16x384xf32> to vector<16x384xbf16>
    %cst_24 = arith.constant 0.000000e+00 : bf16
    %59 = vector.broadcast %cst_24 : bf16 to vector<1x384xbf16>
    %60 = vector.extract_strided_slice %58 {offsets = [0, 0], sizes = [15, 384], strides = [1, 1]} : vector<16x384xbf16> to vector<15x384xbf16>
    %61 = tpu.concatenate %59, %60 in 0 : vector<1x384xbf16>, vector<15x384xbf16> -> vector<16x384xbf16>
    %c0_i32_25 = arith.constant 0 : i32
    %62 = arith.sitofp %c0_i32_25 : i32 to bf16
    %63 = vector.shape_cast %18 : vector<16x1xi1> to vector<16x1xi1>
    %64 = vector.broadcast %63 : vector<16x1xi1> to vector<16x384xi1>
    %65 = vector.broadcast %62 : bf16 to vector<16x384xbf16>
    %66 = arith.select %64, %61, %65 : vector<16x384xi1>, vector<16x384xbf16>
    %67 = vector.extract_strided_slice %58 {offsets = [1, 0], sizes = [15, 384], strides = [1, 1]} : vector<16x384xbf16> to vector<15x384xbf16>
    %cst_26 = arith.constant 0.000000e+00 : bf16
    %68 = vector.broadcast %cst_26 : bf16 to vector<1x384xbf16>
    %69 = tpu.concatenate %67, %68 in 0 : vector<15x384xbf16>, vector<1x384xbf16> -> vector<16x384xbf16>
    %c0_i32_27 = arith.constant 0 : i32
    %70 = arith.sitofp %c0_i32_27 : i32 to bf16
    %71 = vector.shape_cast %20 : vector<16x1xi1> to vector<16x1xi1>
    %72 = vector.broadcast %71 : vector<16x1xi1> to vector<16x384xi1>
    %73 = vector.broadcast %70 : bf16 to vector<16x384xbf16>
    %74 = arith.select %72, %69, %73 : vector<16x384xi1>, vector<16x384xbf16>
    %c0_28 = arith.constant 0 : index
    %c0_29 = arith.constant 0 : index
    %c0_30 = arith.constant 0 : index
    %75 = vector.load %arg5[%c0_28, %c0_29, %c0_30] : memref<3x384x192xbf16, #tpu.memory_space<vmem>>, vector<1x384x192xbf16>
    %76 = vector.shape_cast %75 : vector<1x384x192xbf16> to vector<384x192xbf16>
    %cst_31 = arith.constant dense<0.000000e+00> : vector<16x192xf32>
    %77 = tpu.matmul %66, %76, %cst_31 {dimension_numbers = #tpu.dot_dimension_numbers<[1], [0], [0], [1], [0, 0, 1, 1], [], []>} : vector<16x384xbf16>, vector<384x192xbf16>, vector<16x192xf32> -> vector<16x192xf32>
    %c1_32 = arith.constant 1 : index
    %c0_33 = arith.constant 0 : index
    %c0_34 = arith.constant 0 : index
    %78 = vector.load %arg5[%c1_32, %c0_33, %c0_34] : memref<3x384x192xbf16, #tpu.memory_space<vmem>>, vector<1x384x192xbf16>
    %79 = vector.shape_cast %78 : vector<1x384x192xbf16> to vector<384x192xbf16>
    %cst_35 = arith.constant dense<0.000000e+00> : vector<16x192xf32>
    %80 = tpu.matmul %58, %79, %cst_35 {dimension_numbers = #tpu.dot_dimension_numbers<[1], [0], [0], [1], [0, 0, 1, 1], [], []>} : vector<16x384xbf16>, vector<384x192xbf16>, vector<16x192xf32> -> vector<16x192xf32>
    %81 = arith.addf %77, %80 : vector<16x192xf32>
    %c2_36 = arith.constant 2 : index
    %c0_37 = arith.constant 0 : index
    %c0_38 = arith.constant 0 : index
    %82 = vector.load %arg5[%c2_36, %c0_37, %c0_38] : memref<3x384x192xbf16, #tpu.memory_space<vmem>>, vector<1x384x192xbf16>
    %83 = vector.shape_cast %82 : vector<1x384x192xbf16> to vector<384x192xbf16>
    %cst_39 = arith.constant dense<0.000000e+00> : vector<16x192xf32>
    %84 = tpu.matmul %74, %83, %cst_39 {dimension_numbers = #tpu.dot_dimension_numbers<[1], [0], [0], [1], [0, 0, 1, 1], [], []>} : vector<16x384xbf16>, vector<384x192xbf16>, vector<16x192xf32> -> vector<16x192xf32>
    %85 = arith.addf %81, %84 : vector<16x192xf32>
    %c0_40 = arith.constant 0 : index
    %c0_41 = arith.constant 0 : index
    %86 = vector.load %arg6[%c0_40, %c0_41] : memref<1x192xf32, #tpu.memory_space<vmem>>, vector<1x192xf32>
    %87 = vector.broadcast %86 : vector<1x192xf32> to vector<16x192xf32>
    %88 = arith.mulf %85, %87 : vector<16x192xf32>
    %c0_42 = arith.constant 0 : index
    %c0_43 = arith.constant 0 : index
    %89 = vector.load %arg7[%c0_42, %c0_43] : memref<1x192xf32, #tpu.memory_space<vmem>>, vector<1x192xf32>
    %90 = vector.broadcast %89 : vector<1x192xf32> to vector<16x192xf32>
    %91 = arith.addf %88, %90 : vector<16x192xf32>
    %cst_44 = arith.constant 0.000000e+00 : f32
    %92 = vector.broadcast %cst_44 : f32 to vector<16x192xf32>
    %93 = arith.maximumf %91, %92 : vector<16x192xf32>
    %94 = arith.truncf %93 : vector<16x192xf32> to vector<16x192xbf16>
    %cst_45 = arith.constant 0.000000e+00 : bf16
    %95 = vector.broadcast %cst_45 : bf16 to vector<1x192xbf16>
    %96 = vector.extract_strided_slice %94 {offsets = [0, 0], sizes = [15, 192], strides = [1, 1]} : vector<16x192xbf16> to vector<15x192xbf16>
    %97 = tpu.concatenate %95, %96 in 0 : vector<1x192xbf16>, vector<15x192xbf16> -> vector<16x192xbf16>
    %c0_i32_46 = arith.constant 0 : i32
    %98 = arith.sitofp %c0_i32_46 : i32 to bf16
    %99 = vector.shape_cast %18 : vector<16x1xi1> to vector<16x1xi1>
    %100 = vector.broadcast %99 : vector<16x1xi1> to vector<16x192xi1>
    %101 = vector.broadcast %98 : bf16 to vector<16x192xbf16>
    %102 = arith.select %100, %97, %101 : vector<16x192xi1>, vector<16x192xbf16>
    %103 = vector.extract_strided_slice %94 {offsets = [1, 0], sizes = [15, 192], strides = [1, 1]} : vector<16x192xbf16> to vector<15x192xbf16>
    %cst_47 = arith.constant 0.000000e+00 : bf16
    %104 = vector.broadcast %cst_47 : bf16 to vector<1x192xbf16>
    %105 = tpu.concatenate %103, %104 in 0 : vector<15x192xbf16>, vector<1x192xbf16> -> vector<16x192xbf16>
    %c0_i32_48 = arith.constant 0 : i32
    %106 = arith.sitofp %c0_i32_48 : i32 to bf16
    %107 = vector.shape_cast %20 : vector<16x1xi1> to vector<16x1xi1>
    %108 = vector.broadcast %107 : vector<16x1xi1> to vector<16x192xi1>
    %109 = vector.broadcast %106 : bf16 to vector<16x192xbf16>
    %110 = arith.select %108, %105, %109 : vector<16x192xi1>, vector<16x192xbf16>
    %c0_49 = arith.constant 0 : index
    %c0_50 = arith.constant 0 : index
    %c0_51 = arith.constant 0 : index
    %111 = vector.load %arg8[%c0_49, %c0_50, %c0_51] : memref<3x192x128xbf16, #tpu.memory_space<vmem>>, vector<1x192x128xbf16>
    %112 = vector.shape_cast %111 : vector<1x192x128xbf16> to vector<192x128xbf16>
    %cst_52 = arith.constant dense<0.000000e+00> : vector<16x128xf32>
    %113 = tpu.matmul %102, %112, %cst_52 {dimension_numbers = #tpu.dot_dimension_numbers<[1], [0], [0], [1], [0, 0, 1, 1], [], []>} : vector<16x192xbf16>, vector<192x128xbf16>, vector<16x128xf32> -> vector<16x128xf32>
    %c1_53 = arith.constant 1 : index
    %c0_54 = arith.constant 0 : index
    %c0_55 = arith.constant 0 : index
    %114 = vector.load %arg8[%c1_53, %c0_54, %c0_55] : memref<3x192x128xbf16, #tpu.memory_space<vmem>>, vector<1x192x128xbf16>
    %115 = vector.shape_cast %114 : vector<1x192x128xbf16> to vector<192x128xbf16>
    %cst_56 = arith.constant dense<0.000000e+00> : vector<16x128xf32>
    %116 = tpu.matmul %94, %115, %cst_56 {dimension_numbers = #tpu.dot_dimension_numbers<[1], [0], [0], [1], [0, 0, 1, 1], [], []>} : vector<16x192xbf16>, vector<192x128xbf16>, vector<16x128xf32> -> vector<16x128xf32>
    %117 = arith.addf %113, %116 : vector<16x128xf32>
    %c2_57 = arith.constant 2 : index
    %c0_58 = arith.constant 0 : index
    %c0_59 = arith.constant 0 : index
    %118 = vector.load %arg8[%c2_57, %c0_58, %c0_59] : memref<3x192x128xbf16, #tpu.memory_space<vmem>>, vector<1x192x128xbf16>
    %119 = vector.shape_cast %118 : vector<1x192x128xbf16> to vector<192x128xbf16>
    %cst_60 = arith.constant dense<0.000000e+00> : vector<16x128xf32>
    %120 = tpu.matmul %110, %119, %cst_60 {dimension_numbers = #tpu.dot_dimension_numbers<[1], [0], [0], [1], [0, 0, 1, 1], [], []>} : vector<16x192xbf16>, vector<192x128xbf16>, vector<16x128xf32> -> vector<16x128xf32>
    %121 = arith.addf %117, %120 : vector<16x128xf32>
    %c0_61 = arith.constant 0 : index
    %c0_62 = arith.constant 0 : index
    %122 = vector.load %arg9[%c0_61, %c0_62] : memref<1x128xf32, #tpu.memory_space<vmem>>, vector<1x128xf32>
    %123 = vector.broadcast %122 : vector<1x128xf32> to vector<16x128xf32>
    %124 = arith.mulf %121, %123 : vector<16x128xf32>
    %c0_63 = arith.constant 0 : index
    %c0_64 = arith.constant 0 : index
    %125 = vector.load %arg10[%c0_63, %c0_64] : memref<1x128xf32, #tpu.memory_space<vmem>>, vector<1x128xf32>
    %126 = vector.broadcast %125 : vector<1x128xf32> to vector<16x128xf32>
    %127 = arith.addf %124, %126 : vector<16x128xf32>
    %cst_65 = arith.constant 0.000000e+00 : f32
    %128 = vector.broadcast %cst_65 : f32 to vector<16x128xf32>
    %129 = arith.maximumf %127, %128 : vector<16x128xf32>
    %130 = vector.shape_cast %129 : vector<16x128xf32> to vector<1x16x128xf32>
    %131 = tpu.transpose %130, [0, 2, 1] : vector<1x16x128xf32> -> vector<1x128x16xf32>
    %132 = vector.extract_strided_slice %131 {offsets = [0, 0, 0], sizes = [1, 96, 16], strides = [1, 1, 1]} : vector<1x128x16xf32> to vector<1x96x16xf32>
    %c0_66 = arith.constant 0 : index
    %c0_67 = arith.constant 0 : index
    %c0_68 = arith.constant 0 : index
    %133 = vector.load %arg11[%c0_66, %c0_67, %c0_68] : memref<1x96x16xf32, #tpu.memory_space<vmem>>, vector<1x96x16xf32>
    tpu.vector_store %arg11[%c0_66, %c0_67, %c0_68], %132 {strides = array<i32>} : memref<1x96x16xf32, #tpu.memory_space<vmem>>, vector<1x96x16xf32>,
    return
  }
  func.func @transform_0(%arg0: i32) -> (i32, i32, i32) {
    %c0_i32 = arith.constant 0 : i32
    %c0_i32_0 = arith.constant 0 : i32
    %c0_i32_1 = arith.constant 0 : i32
    return %arg0, %c0_i32, %c0_i32_0 : i32, i32, i32
  }
  func.func @transform_1(%arg0: i32) -> (i32, i32, i32) {
    %c0_i32 = arith.constant 0 : i32
    %c0_i32_0 = arith.constant 0 : i32
    %c0_i32_1 = arith.constant 0 : i32
    %c0_i32_2 = arith.constant 0 : i32
    return %c0_i32, %c0_i32_0, %c0_i32_1 : i32, i32, i32
  }
  func.func @transform_2(%arg0: i32) -> (i32, i32) {
    %c0_i32 = arith.constant 0 : i32
    %c0_i32_0 = arith.constant 0 : i32
    %c0_i32_1 = arith.constant 0 : i32
    return %c0_i32, %c0_i32_0 : i32, i32
  }
  func.func @transform_3(%arg0: i32) -> (i32, i32) {
    %c0_i32 = arith.constant 0 : i32
    %c0_i32_0 = arith.constant 0 : i32
    %c0_i32_1 = arith.constant 0 : i32
    return %c0_i32, %c0_i32_0 : i32, i32
  }
  func.func @transform_4(%arg0: i32) -> (i32, i32, i32) {
    %c0_i32 = arith.constant 0 : i32
    %c0_i32_0 = arith.constant 0 : i32
    %c0_i32_1 = arith.constant 0 : i32
    %c0_i32_2 = arith.constant 0 : i32
    return %c0_i32, %c0_i32_0, %c0_i32_1 : i32, i32, i32
  }
  func.func @transform_5(%arg0: i32) -> (i32, i32) {
    %c0_i32 = arith.constant 0 : i32
    %c0_i32_0 = arith.constant 0 : i32
    %c0_i32_1 = arith.constant 0 : i32
    return %c0_i32, %c0_i32_0 : i32, i32
  }
  func.func @transform_6(%arg0: i32) -> (i32, i32) {
    %c0_i32 = arith.constant 0 : i32
    %c0_i32_0 = arith.constant 0 : i32
    %c0_i32_1 = arith.constant 0 : i32
    return %c0_i32, %c0_i32_0 : i32, i32
  }
  func.func @transform_7(%arg0: i32) -> (i32, i32, i32) {
    %c0_i32 = arith.constant 0 : i32
    %c0_i32_0 = arith.constant 0 : i32
    %c0_i32_1 = arith.constant 0 : i32
    %c0_i32_2 = arith.constant 0 : i32
    return %c0_i32, %c0_i32_0, %c0_i32_1 : i32, i32, i32
  }
  func.func @transform_8(%arg0: i32) -> (i32, i32) {
    %c0_i32 = arith.constant 0 : i32
    %c0_i32_0 = arith.constant 0 : i32
    %c0_i32_1 = arith.constant 0 : i32
    return %c0_i32, %c0_i32_0 : i32, i32
  }
  func.func @transform_9(%arg0: i32) -> (i32, i32) {
    %c0_i32 = arith.constant 0 : i32
    %c0_i32_0 = arith.constant 0 : i32
    %c0_i32_1 = arith.constant 0 : i32
    return %c0_i32, %c0_i32_0 : i32, i32
  }
  func.func @transform_10(%arg0: i32) -> (i32, i32, i32) {
    %c0_i32 = arith.constant 0 : i32
    %c0_i32_0 = arith.constant 0 : i32
    %c0_i32_1 = arith.constant 0 : i32
    return %arg0, %c0_i32, %c0_i32_0 : i32, i32, i32
  }
}

</mosaic_0001>

<bundles_post_ra>
// kernel: tpu_custom_call.1
= control target key start
LH: loop header
LB: loop body
LE: loop exit
PB: predicated region body
PF: predicated region fallthrough
CT: control target
= control target key end

     0   :  { %s4078_s13 = smov 0   ;;  %s5123_s0 = inlined_call_operand.vmem [shape: bf16[2,16,128], index: 0, kind: input, shape index: {}]   ;;  %s5124_s1 = inlined_call_operand.vmem [shape: bf16[3,128,384], index: 1, kind: input, shape index: {}]   ;;  %s5125_s2 = inlined_call_operand.vmem [shape: f32[1,384], index: 2, kind: input, shape index: {}]   ;;  %s5126_s3 = inlined_call_operand.vmem [shape: f32[1,384], index: 3, kind: input, shape index: {}]   ;;  %s5127_s4 = inlined_call_operand.vmem [shape: bf16[3,384,192], index: 4, kind: input, shape index: {}]   ;;  %s5128_s5 = inlined_call_operand.vmem [shape: f32[1,192], index: 5, kind: input, shape index: {}]   ;;  %s5129_s6 = inlined_call_operand.vmem [shape: f32[1,192], index: 6, kind: input, shape index: {}]   ;;  %s5130_s7 = inlined_call_operand.vmem [shape: bf16[3,192,128], index: 7, kind: input, shape index: {}]   ;;  %s5131_s8 = inlined_call_operand.vmem [shape: f32[1,128], index: 8, kind: input, shape index: {}]   ;;  %s5132_s9 = inlined_call_operand.vmem [shape: f32[1,128], index: 9, kind: input, shape index: {}]   ;;  %s5133_s10 = inlined_call_operand.vmem [shape: f32[2,96,16], index: 10, kind: output, shape index: {}]  }
   0x1 LB: > { %s3027_s14 = sadd.s32 4294967295, %s4017_s13   ;;  %p3031_p0 = scmp.ge.s32.totalorder %s4017_s13, 1  ;;  %s4017_s13 = sphi %s4078_s13, %s20_s13  }
   0x2   : > { %p312_p1 = scmp.lt.s32.totalorder %s4017_s13, 3 }
   0x4   : > { %p313_p2 = pnand %p3031_p0, %p312_p1 }
   0x5   : > { %v3662_v0 = vld [vmem:[%s5124_s1 + $0xc4] ss:$12 sps:$4 sm:$0xff] (!%p313_p2)   ;;  %v4019_v1 = vmov (!%p313_p2), 0.0   ;;  %v3664_v2 = vld [vmem:[%s5124_s1 + $0xc8] ss:$12 sps:$4 sm:$0xff] (!%p313_p2)   ;;  %vm4020_vm0 = vmmov (!%p313_p2), 0   ;;  %v363_v33 = vlaneseq (!%p313_p2) }
   0x6   : > { %316 = sbr.rel (%p313_p2) target bundleno = 1230 (0x4ce), region = 60  ;;  %3545 = vmatprep.subr.bf16.mxu1 (!%p313_p2), %v4019_v1  ;;  %3561 = vmatprep.mubr.msk.bf16.mxu1 (!%p313_p2), %vm4020_vm0, %v4019_v1  ;;  %v3665_v3 = vld [vmem:[%s5124_s1 + $0xc0] ss:$12 sps:$4 sm:$0xff] (!%p313_p2)   ;;  %v3666_v4 = vld [vmem:[%s5124_s1 + $0xdc] ss:$12 sps:$4 sm:$0xff] (!%p313_p2)   ;;  %v4021_v5 = vmov (!%p313_p2), 0  }
   0x7   : > { %640 = vmatprep.subr.bf16.mxu0 (!%p313_p2), %v3662_v0  ;;  %3546 = vmatpush3.bf16.msra.mxu1 (!%p313_p2), %v3664_v2  ;;  %v3668_v6 = vld [vmem:[%s5124_s1 + $0xe0] ss:$12 sps:$4 sm:$0xff] (!%p313_p2)   ;;  %v3669_v7 = vld [vmem:[%s5124_s1 + $0xd8] ss:$12 sps:$4 sm:$0xff] (!%p313_p2)   ;;  %p350_p3 = scmp.lt.s32.totalorder (!%p313_p2), %s3027_s14, 1  ;;  %v4216_v37 = vshrl.u32 (!%p313_p2), %v363_v33, 7 }
   0x8   : > { %672 = vmatprep.mubr.bf16.mxu0 (!%p313_p2), %v4021_v5  ;;  %641 = vmatpush1.bf16.msra.mxu0 (!%p313_p2), %v3665_v3  ;;  %v3670_v8 = vld [vmem:[%s5124_s1 + $0xf4] ss:$12 sps:$4 sm:$0xff] (!%p313_p2)   ;;  %v3672_v9 = vld [vmem:[%s5124_s1 + $0xf8] ss:$12 sps:$4 sm:$0xff] (!%p313_p2)   ;;  %v3673_v10 = vld [vmem:[%s5124_s1 + $0xf0] ss:$12 sps:$4 sm:$0xff] (!%p313_p2)  }
   0x9   : > { %3547 = vmatprep.subr.bf16.mxu1 (!%p313_p2), %v4019_v1  ;;  %642 = vmatprep.subr.bf16.mxu0 (!%p313_p2), %v3666_v4  ;;  %v3674_v11 = vld [vmem:[%s5124_s1 + $0x10c] ss:$12 sps:$4 sm:$0xff] (!%p313_p2)   ;;  %v3676_v12 = vld [vmem:[%s5124_s1 + $0x110] ss:$12 sps:$4 sm:$0xff] (!%p313_p2)   ;;  %v3677_v13 = vld [vmem:[%s5124_s1 + $0x108] ss:$12 sps:$4 sm:$0xff] (!%p313_p2)  }
   0xa   : > { %v3678_v14 = vld [vmem:[%s5124_s1 + $0x124] ss:$12 sps:$4 sm:$0xff] (!%p313_p2)   ;;  %v3680_v15 = vld [vmem:[%s5124_s1 + $0x128] ss:$12 sps:$4 sm:$0xff] (!%p313_p2)   ;;  %v3681_v16 = vld [vmem:[%s5124_s1 + $0x120] ss:$12 sps:$4 sm:$0xff] (!%p313_p2)  }
   0xb   : > { %3548 = vmatpush3.bf16.msra.mxu1 (!%p313_p2), %v3668_v6  ;;  %v3682_v17 = vld [vmem:[%s5124_s1 + $0x13c] ss:$12 sps:$4 sm:$0xff] (!%p313_p2)   ;;  %v3684_v18 = vld [vmem:[%s5124_s1 + $0x140] ss:$12 sps:$4 sm:$0xff] (!%p313_p2)   ;;  %v3685_v19 = vld [vmem:[%s5124_s1 + $0x138] ss:$12 sps:$4 sm:$0xff] (!%p313_p2)  }
   0xc   : > { %643 = vmatpush1.bf16.msra.mxu0 (!%p313_p2), %v3669_v7  ;;  %3549 = vmatprep.subr.bf16.mxu1 (!%p313_p2), %v4019_v1  ;;  %v3686_v20 = vld [vmem:[%s5124_s1 + $0x154] ss:$12 sps:$4 sm:$0xff] (!%p313_p2)   ;;  %v3688_v21 = vld [vmem:[%s5124_s1 + $0x158] ss:$12 sps:$4 sm:$0xff] (!%p313_p2)   ;;  %v3689_v22 = vld [vmem:[%s5124_s1 + $0x150] ss:$12 sps:$4 sm:$0xff] (!%p313_p2)  }
   0xd   : > { %644 = vmatprep.subr.bf16.mxu0 %v3670_v8  ;;  %s5147_s14 = smov (!%p350_p3, %s3027_s14), 1  ;;  %v3690_v23 = vld [vmem:[%s5124_s1 + $0x16c] ss:$12 sps:$4 sm:$0xff]   ;;  %v3692_v24 = vld [vmem:[%s5124_s1 + $0x170] ss:$12 sps:$4 sm:$0xff]   ;;  %v370_v41 = vand.u32 15, %v4216_v37 }
   0xe   : > { %s3517_s23 = sshll.u32 %s5147_s14, 3  ;;  %v3693_v25 = vld [vmem:[%s5124_s1 + $0x168] ss:$12 sps:$4 sm:$0xff]   ;;  %v3697_v26 = vld [vmem:[%s5124_s1 + $0x4] ss:$12 sps:$4 sm:$0xff]   ;;  %vm4022_vm3 = vmmov 1  }
   0xf   : > { %3550 = vmatpush3.bf16.msra.mxu1 %v3672_v9  ;;  %s354_s12 = scalar_lea.vmem %s5123_s0, %s3517_s23  ;;  %v3698_v28 = vld [vmem:[%s5124_s1 + $0x8] ss:$12 sps:$4 sm:$0xff]   ;;  %v3695_v29 = vld [vmem:[%s5124_s1] ss:$12 sps:$4 sm:$0xff]   ;;  %v3699_v32 = vld [vmem:[%s5124_s1 + $0x18] ss:$12 sps:$4 sm:$0xff]  }
  0x10   : > { %645 = vmatpush1.bf16.msra.mxu0 %v3673_v10  ;;  %3551 = vmatprep.subr.bf16.mxu1 %v4019_v1  ;;  %v4182_v27 = vld [vmem:[%s354_s12] sm:$0xff]   ;;  %v3701_v30 = vld [vmem:[%s5124_s1 + $0x1c] ss:$12 sps:$4 sm:$0xff]   ;;  %v3709_v38 = vld [vmem:[%s5124_s1 + $0x4c] ss:$12 sps:$4 sm:$0xff]   ;;  %vm4242_vm1 = vcmp.ne.s32.totalorder %v370_v41, 0 }
  0x11   : > { %646 = vmatprep.subr.bf16.mxu0 %v3674_v11  ;;  %v3702_v31 = vld [vmem:[%s5124_s1 + $0x20] ss:$12 sps:$4 sm:$0xff]   ;;  %v3706_v35 = vld [vmem:[%s5124_s1 + $0x38] ss:$12 sps:$4 sm:$0xff]   ;;  %v3703_v36 = vld [vmem:[%s5124_s1 + $0x30] ss:$12 sps:$4 sm:$0xff]  }
  0x12   : > { %v3705_v34 = vld [vmem:[%s5124_s1 + $0x34] ss:$12 sps:$4 sm:$0xff]   ;;  %v3710_v39 = vld [vmem:[%s5124_s1 + $0x50] ss:$12 sps:$4 sm:$0xff]   ;;  %v3715_v47 = vld [vmem:[%s5124_s1 + $0x78] ss:$12 sps:$4 sm:$0xff]  }
  0x13   : > { %3552 = vmatpush3.bf16.msra.mxu1 %v3676_v12  ;;  %v3707_v40 = vld [vmem:[%s5124_s1 + $0x48] ss:$12 sps:$4 sm:$0xff]   ;;  %v3713_v42 = vld [vmem:[%s5124_s1 + $0x64] ss:$12 sps:$4 sm:$0xff]   ;;  %v3711_v44 = vld [vmem:[%s5124_s1 + $0x60] ss:$12 sps:$4 sm:$0xff]  }
  0x14   : > { %647 = vmatpush1.bf16.msra.mxu0 %v3677_v13  ;;  %3553 = vmatprep.subr.bf16.mxu1 %v4019_v1  ;;  %v3714_v43 = vld [vmem:[%s5124_s1 + $0x68] ss:$12 sps:$4 sm:$0xff]   ;;  %v3718_v48 = vld [vmem:[%s5124_s1 + $0x80] ss:$12 sps:$4 sm:$0xff]   ;;  %v402_v50 = vshrl.u32 %v4182_v27, 16  ;;  %vm417_vm2 = vmpackc.low %vm4242_vm1, %vm4242_vm1  ;;  %v405_v51 = vshll.u32 %v4182_v27, 16 }
  0x15   : > { %648 = vmatprep.subr.bf16.mxu0 %v3678_v14  ;;  %v3717_v45 = vld [vmem:[%s5124_s1 + $0x7c] ss:$12 sps:$4 sm:$0xff]   ;;  %v3721_v49 = vld [vmem:[%s5124_s1 + $0x94] ss:$12 sps:$4 sm:$0xff]   ;;  %vm418_vm4 = vmpackc.low %vm4022_vm3, %vm4022_vm3  ;;  %vm410_vm5 = vsmask.f32 256 }
  0x16   : > { %v3722_v52 = vld [vmem:[%s5124_s1 + $0x98] ss:$12 sps:$4 sm:$0xff]   ;;  %v404_v53 = vrot.slane %v402_v50, 7  ;;  %v3719_v54 = vld [vmem:[%s5124_s1 + $0x90] ss:$12 sps:$4 sm:$0xff]   ;;  %vm409_vm6 = vcmask 1040384  }
  0x17   : > { %3554 = vmatpush3.bf16.msra.mxu1 %v3680_v15  ;;  %v419_v55 = vsel %vm417_vm2, 65537, %v4021_v5  ;;  %v4272_v56 = vsel %vm418_vm4, 65537, %v4021_v5  ;;  %v3725_v57 = vld [vmem:[%s5124_s1 + $0xac] ss:$12 sps:$4 sm:$0xff]   ;;  %v3723_v58 = vld [vmem:[%s5124_s1 + $0xa8] ss:$12 sps:$4 sm:$0xff]   ;;  %vm4288_vm7 = vmand %vm409_vm6, %vm410_vm5 }
  0x18   : > { %649 = vmatpush1.bf16.msra.mxu0 %v3681_v16  ;;  %3555 = vmatprep.subr.bf16.mxu1 %v4019_v1  ;;  %v3726_v59 = vld [vmem:[%s5124_s1 + $0xb0] ss:$12 sps:$4 sm:$0xff]   ;;  %v407_v60 = vor.u32 %v405_v51, %v404_v53  ;;  %v3036_v61 = vcombine.low %v419_v55, %v4272_v56  ;;  %v3730_v3 = vld [vmem:[%s5124_s1 + $0x188] ss:$12 sps:$4 sm:$0xff]   ;;  %v3727_v4 = vld [vmem:[%s5124_s1 + $0x180] ss:$12 sps:$4 sm:$0xff]  }
  0x19   : > { %650 = vmatprep.subr.bf16.mxu0 %v3682_v17  ;;  %v3729_v63 = vld [vmem:[%s5124_s1 + $0x184] ss:$12 sps:$4 sm:$0xff]   ;;  %v3733_v6 = vld [vmem:[%s5124_s1 + $0x19c] ss:$12 sps:$4 sm:$0xff]   ;;  %v3734_v7 = vld [vmem:[%s5124_s1 + $0x1a0] ss:$12 sps:$4 sm:$0xff]  }
  0x1a   : > { %v412_v0 = vsel %vm4288_vm7, 0, %v407_v60  ;;  %vm4297_vm8 = vcmp.ne.s16.totalorder %v3036_v61, 0  ;;  %v3731_v8 = vld [vmem:[%s5124_s1 + $0x198] ss:$12 sps:$4 sm:$0xff]   ;;  %v3737_v9 = vld [vmem:[%s5124_s1 + $0x1b4] ss:$12 sps:$4 sm:$0xff]  }
  0x1b   : > { %3556 = vmatpush3.bf16.msra.mxu1 %v3684_v18  ;;  %v3738_v10 = vld [vmem:[%s5124_s1 + $0x1b8] ss:$12 sps:$4 sm:$0xff]   ;;  %v3735_v11 = vld [vmem:[%s5124_s1 + $0x1b0] ss:$12 sps:$4 sm:$0xff]   ;;  %v365_v12 = vadd.s32 8, %v4216_v37  ;;  %vm429_vm10 = vcmask 1047552  }
  0x1c   : > { %651 = vmatpush1.bf16.msra.mxu0 %v3685_v19  ;;  %3557 = vmatprep.subr.bf16.mxu1 %v4019_v1  ;;  %v3741_v13 = vld [vmem:[%s5124_s1 + $0x1cc] ss:$12 sps:$4 sm:$0xff]   ;;  %v3742_v14 = vld [vmem:[%s5124_s1 + $0x1d0] ss:$12 sps:$4 sm:$0xff]   ;;  %v3739_v15 = vld [vmem:[%s5124_s1 + $0x1c8] ss:$12 sps:$4 sm:$0xff]  }
  0x1d   : > { %652 = vmatprep.subr.bf16.mxu0 %v3686_v20  ;;  %v377_v16 = vand.u32 15, %v365_v12  ;;  %v3745_v17 = vld [vmem:[%s5124_s1 + $0x1e4] ss:$12 sps:$4 sm:$0xff]   ;;  %v3746_v18 = vld [vmem:[%s5124_s1 + $0x1e8] ss:$12 sps:$4 sm:$0xff]   ;;  %vm2604_vm15 = vcmask 523264  }
  0x1e   : > { %v3743_v19 = vld [vmem:[%s5124_s1 + $0x1e0] ss:$12 sps:$4 sm:$0xff]   ;;  %vm430_vm11 = vsmask.f32 7424  ;;  %v3755_v33 = vld [vmem:[%s5124_s1 + $0x228] ss:$12 sps:$4 sm:$0xff]  }
  0x1f   : > { %3558 = vmatpush3.bf16.msra.mxu1 %v3688_v21  ;;  %vm4356_vm9 = vcmp.ne.s32.totalorder %v377_v16, 15  ;;  %v3749_v21 = vld [vmem:[%s5124_s1 + $0x1fc] ss:$12 sps:$4 sm:$0xff]   ;;  %vm4376_vm13 = vmand %vm429_vm10, %vm430_vm11  ;;  %v3797_v46 = vld [vmem:[%s5127_s4 + $0x2a4] ss:$8 sps:$4 sm:$0xff]   ;;  %s3649_s11 = smul.u32 96, %s5147_s14 }
  0x20   : > { %653 = vmatpush1.bf16.msra.mxu0 %v3689_v22  ;;  %3559 = vmatprep.subr.bf16.mxu1 %v4019_v1  ;;  %v3747_v22 = vld [vmem:[%s5124_s1 + $0x1f8] ss:$12 sps:$4 sm:$0xff]   ;;  %vm438_vm12 = vmpackc.low %vm4356_vm9, %vm4356_vm9  ;;  %v3771_v55 = vld [vmem:[%s5127_s4 + $0x1c0] ss:$8 sps:$4 sm:$0xff]  }
  0x21   : > { %654 = vmatprep.subr.bf16.mxu0 %v3690_v23  ;;  %v3750_v23 = vld [vmem:[%s5124_s1 + $0x200] ss:$12 sps:$4 sm:$0xff]   ;;  %v3801_v53 = vld [vmem:[%s5127_s4 + $0x2b0] ss:$8 sps:$4 sm:$0xff]   ;;  %v3827_v20 = vld [vmem:[%s5127_s4 + $0x2f4] ss:$8 sps:$4 sm:$0xff]   ;;  %s359_s17 = scalar_lea.vmem %s5133_s10, %s3649_s11 }
  0x22   : > { %v3779_v60 = vld [vmem:[%s5127_s4 + $0x1e4] ss:$8 sps:$4 sm:$0xff]   ;;  %v3813_v61 = vld [vmem:[%s5127_s4 + $0x2d0] ss:$8 sps:$4 sm:$0xff]  }
  0x23   : > { %3560 = vmatpush3.bf16.msra.mxu1 %v3692_v24  ;;  %v3753_v24 = vld [vmem:[%s5124_s1 + $0x214] ss:$12 sps:$4 sm:$0xff]   ;;  %v3804_v12 = vld [vmem:[%s5127_s4 + $0x230] ss:$8 sps:$4 sm:$0xff]   ;;  %v3821_v16 = vld [vmem:[%s5127_s4 + $0x2e4] ss:$8 sps:$4 sm:$0xff]  }
  0x24   : > { %655 = vmatpush1.bf16.msra.mxu0 %v3693_v25  ;;  %3565 = vmatprep.subr.bf16.mxu1 %v4019_v1  ;;  %v4001_v62 = vld [vmem:[%s5130_s7 + $0xd0] sm:$0xff]   ;;  %v4002_v2 = vld [vmem:[%s5130_s7 + $0xd8] sm:$0xff]  }
  0x25   : > { %852 = vmatprep.subr.bf16.mxu0 %v3697_v26  ;;  %v3754_v26 = vld [vmem:[%s5124_s1 + $0x218] ss:$12 sps:$4 sm:$0xff]  }
  0x26   : > { %3562 = vmatmul.mubr.bf16.vlgmr.msra.gmra.mrb[0].mxu1 %v4182_v27 }
  0x27   : > { %3566 = vmatpush3.bf16.msra.mxu1 %v3698_v28  ;;  %673 = vmatmul.mubr.bf16.vlgmr.msra.gmra.mrb[0].mxu0 %v4182_v27  ;;  %v3751_v28 = vld [vmem:[%s5124_s1 + $0x210] ss:$12 sps:$4 sm:$0xff]   ;;  %v3783_v27 = vld [vmem:[%s5127_s4 + $0x280] ss:$8 sps:$4 sm:$0xff]  }
  0x28   : > { %853 = vmatpush1.bf16.msra.mxu0 %v3695_v29  ;;  %3567 = vmatprep.subr.bf16.mxu1 %v4019_v1  ;;  %v3757_v29 = vld [vmem:[%s5124_s1 + $0x22c] ss:$12 sps:$4 sm:$0xff]  }
  0x29   : > { %854 = vmatprep.subr.bf16.mxu0 %v3701_v30  ;;  %3581 = vmatprep.mubr.msk.bf16.mxu1 %vm4020_vm0, %v4019_v1  ;;  %v426_v30 = vrot.slane %v405_v51, 1  ;;  %v3768_v51 = vld [vmem:[%s5127_s4 + $0x1b0] ss:$8 sps:$4 sm:$0xff]  }
  0x2a   : > { %884 = vmatprep.mubr.bf16.mxu0 %v4021_v5 }
  0x2b   : > { %3568 = vmatpush3.bf16.msra.mxu1 %v3702_v31  ;;  %v440_v31 = vsel %vm438_vm12, 65537, %v4021_v5 }
  0x2c   : > { %855 = vmatpush1.bf16.msra.mxu0 %v3699_v32  ;;  %3569 = vmatprep.subr.bf16.mxu1 %v4019_v1  ;;  %v3758_v32 = vld [vmem:[%s5124_s1 + $0x230] ss:$12 sps:$4 sm:$0xff]  }
  0x2d   : > { %856 = vmatprep.subr.bf16.mxu0 %v3705_v34  ;;  %v3761_v34 = vld [vmem:[%s5127_s4 + $0x184] ss:$8 sps:$4 sm:$0xff]  }
  0x2f   : > { %3570 = vmatpush3.bf16.msra.mxu1 %v3706_v35  ;;  %v427_v35 = vor.u32 %v426_v30, %v402_v50  ;;  %v3803_v50 = vld [vmem:[%s5127_s4 + $0x2b4] ss:$8 sps:$4 sm:$0xff]   ;;  %v4567_v30 = vsub.s32 0, %v4216_v37 }
  0x30   : > { %857 = vmatpush1.bf16.msra.mxu0 %v3703_v36  ;;  %3571 = vmatprep.subr.bf16.mxu1 %v4019_v1  ;;  %v3037_v36 = vcombine.low %v4272_v56, %v440_v31  ;;  %v3776_v56 = vld [vmem:[%s5127_s4 + $0x1d4] ss:$8 sps:$4 sm:$0xff]   ;;  %v4570_v31 = vsub.s32 1, %v4216_v37 }
  0x31   : > { %858 = vmatprep.subr.bf16.mxu0 %v3709_v38  ;;  %v3785_v38 = vld [vmem:[%s5127_s4 + $0x284] ss:$8 sps:$4 sm:$0xff]   ;;  %v432_v41 = vsel %vm4376_vm13, %v427_v35, 0 }
  0x32   : > { %vm4420_vm14 = vcmp.ne.s16.totalorder %v3037_v36, 0 }
  0x33   : > { %3572 = vmatpush3.bf16.msra.mxu1 %v3710_v39  ;;  %v3759_v39 = vld [vmem:[%s5127_s4 + $0x180] ss:$8 sps:$4 sm:$0xff]  }
  0x34   : > { %859 = vmatpush1.bf16.msra.mxu0 %v3707_v40  ;;  %3573 = vmatprep.subr.bf16.mxu1 %v4019_v1  ;;  %v3764_v40 = vld [vmem:[%s5127_s4 + $0x194] ss:$8 sps:$4 sm:$0xff]  }
  0x35   : > { %860 = vmatprep.subr.bf16.mxu0 %v3713_v42 }
  0x37   : > { %3574 = vmatpush3.bf16.msra.mxu1 %v3714_v43  ;;  %v3762_v43 = vld [vmem:[%s5127_s4 + $0x190] ss:$8 sps:$4 sm:$0xff]  }
  0x38   : > { %861 = vmatpush1.bf16.msra.mxu0 %v3711_v44  ;;  %3575 = vmatprep.subr.bf16.mxu1 %v4019_v1  ;;  %v3767_v44 = vld [vmem:[%s5127_s4 + $0x1a4] ss:$8 sps:$4 sm:$0xff]  }
  0x39   : > { %862 = vmatprep.subr.bf16.mxu0 %v3717_v45  ;;  %v3789_v45 = vld [vmem:[%s5127_s4 + $0x290] ss:$8 sps:$4 sm:$0xff]  }
  0x3b   : > { %3576 = vmatpush3.bf16.msra.mxu1 %v3718_v48  ;;  %v3770_v48 = vld [vmem:[%s5127_s4 + $0x1b4] ss:$8 sps:$4 sm:$0xff]  }
  0x3c   : > { %863 = vmatpush1.bf16.msra.mxu0 %v3715_v47  ;;  %3577 = vmatprep.subr.bf16.mxu1 %v4019_v1  ;;  %v3765_v47 = vld [vmem:[%s5127_s4 + $0x1a0] ss:$8 sps:$4 sm:$0xff]  }
  0x3d   : > { %864 = vmatprep.subr.bf16.mxu0 %v3721_v49  ;;  %v3795_v49 = vld [vmem:[%s5127_s4 + $0x2a0] ss:$8 sps:$4 sm:$0xff]  }
  0x3f   : > { %3578 = vmatpush3.bf16.msra.mxu1 %v3722_v52  ;;  %v3773_v52 = vld [vmem:[%s5127_s4 + $0x1c4] ss:$8 sps:$4 sm:$0xff]  }
  0x40   : > { %865 = vmatpush1.bf16.msra.mxu0 %v3719_v54  ;;  %3579 = vmatprep.subr.bf16.mxu1 %v4019_v1  ;;  %v3809_v54 = vld [vmem:[%s5127_s4 + $0x2c4] ss:$8 sps:$4 sm:$0xff]  }
  0x41   : > { %866 = vmatprep.subr.bf16.mxu0 %v3725_v57  ;;  %v3807_v57 = vld [vmem:[%s5127_s4 + $0x2c0] ss:$8 sps:$4 sm:$0xff]  }
  0x43   : > { %3580 = vmatpush3.bf16.msra.mxu1 %v3726_v59  ;;  %v3774_v59 = vld [vmem:[%s5127_s4 + $0x1d0] ss:$8 sps:$4 sm:$0xff]  }
  0x44   : > { %867 = vmatpush1.bf16.msra.mxu0 %v3723_v58  ;;  %3585 = vmatprep.subr.bf16.mxu1 %v4019_v1  ;;  %v3815_v58 = vld [vmem:[%s5127_s4 + $0x2d4] ss:$8 sps:$4 sm:$0xff]  }
  0x45   : > { %1097 = vmatprep.subr.bf16.mxu0 %v3729_v63  ;;  %v3777_v63 = vld [vmem:[%s5127_s4 + $0x1e0] ss:$8 sps:$4 sm:$0xff]  }
  0x46   : > { %3582 = vmatmul.mubr.msk.bf16.vlgmr.msra.gmra.mrb[0].mxu1 %vm4297_vm8, %v412_v0 }
  0x47   : > { %3586 = vmatpush3.bf16.msra.mxu1 %v3730_v3  ;;  %3118 = vmatmul.mubr.msk.bf16.vlgmr.msra.gmra.mrb[0].mxu0 %vm4297_vm8, %v412_v0  ;;  %v3782_v0 = vld [vmem:[%s5127_s4 + $0x1f4] ss:$8 sps:$4 sm:$0xff]   ;;  %v3780_v3 = vld [vmem:[%s5127_s4 + $0x1f0] ss:$8 sps:$4 sm:$0xff]  }
  0x48   : > { %1098 = vmatpush1.bf16.msra.mxu0 %v3727_v4  ;;  %3587 = vmatprep.subr.bf16.mxu1 %v4019_v1  ;;  %v3788_v4 = vld [vmem:[%s5127_s4 + $0x204] ss:$8 sps:$4 sm:$0xff]  }
  0x49   : > { %1099 = vmatprep.subr.bf16.mxu0 %v3733_v6  ;;  %3601 = vmatprep.mubr.msk.bf16.mxu1 %vm4020_vm0, %v4019_v1  ;;  %v3786_v6 = vld [vmem:[%s5127_s4 + $0x200] ss:$8 sps:$4 sm:$0xff]   ;;  %vm2959_vm0 = vcmask 130048  }
  0x4a   : > { %1129 = vmatprep.mubr.bf16.mxu0 %v4021_v5 }
  0x4b   : > { %3588 = vmatpush3.bf16.msra.mxu1 %v3734_v7  ;;  %v3794_v7 = vld [vmem:[%s5127_s4 + $0x214] ss:$8 sps:$4 sm:$0xff]  }
  0x4c   : > { %1100 = vmatpush1.bf16.msra.mxu0 %v3731_v8  ;;  %3589 = vmatprep.subr.bf16.mxu1 %v4019_v1  ;;  %v3792_v8 = vld [vmem:[%s5127_s4 + $0x210] ss:$8 sps:$4 sm:$0xff]  }
  0x4d   : > { %1101 = vmatprep.subr.bf16.mxu0 %v3737_v9  ;;  %v3800_v9 = vld [vmem:[%s5127_s4 + $0x224] ss:$8 sps:$4 sm:$0xff]  }
  0x4f   : > { %3590 = vmatpush3.bf16.msra.mxu1 %v3738_v10  ;;  %v3798_v10 = vld [vmem:[%s5127_s4 + $0x220] ss:$8 sps:$4 sm:$0xff]  }
  0x50   : > { %1102 = vmatpush1.bf16.msra.mxu0 %v3735_v11  ;;  %3591 = vmatprep.subr.bf16.mxu1 %v4019_v1  ;;  %v3806_v11 = vld [vmem:[%s5127_s4 + $0x234] ss:$8 sps:$4 sm:$0xff]  }
  0x51   : > { %1103 = vmatprep.subr.bf16.mxu0 %v3741_v13  ;;  %v3812_v13 = vld [vmem:[%s5127_s4 + $0x244] ss:$8 sps:$4 sm:$0xff]  }
  0x53   : > { %3592 = vmatpush3.bf16.msra.mxu1 %v3742_v14  ;;  %v3810_v14 = vld [vmem:[%s5127_s4 + $0x240] ss:$8 sps:$4 sm:$0xff]  }
  0x54   : > { %1104 = vmatpush1.bf16.msra.mxu0 %v3739_v15  ;;  %3593 = vmatprep.subr.bf16.mxu1 %v4019_v1  ;;  %v3818_v15 = vld [vmem:[%s5127_s4 + $0x254] ss:$8 sps:$4 sm:$0xff]  }
  0x55   : > { %1105 = vmatprep.subr.bf16.mxu0 %v3745_v17  ;;  %v3816_v17 = vld [vmem:[%s5127_s4 + $0x250] ss:$8 sps:$4 sm:$0xff]  }
  0x57   : > { %3594 = vmatpush3.bf16.msra.mxu1 %v3746_v18  ;;  %v3819_v18 = vld [vmem:[%s5127_s4 + $0x2e0] ss:$8 sps:$4 sm:$0xff]  }
  0x58   : > { %1106 = vmatpush1.bf16.msra.mxu0 %v3743_v19  ;;  %3595 = vmatprep.subr.bf16.mxu1 %v4019_v1  ;;  %v3824_v19 = vld [vmem:[%s5127_s4 + $0x264] ss:$8 sps:$4 sm:$0xff]  }
  0x59   : > { %1107 = vmatprep.subr.bf16.mxu0 %v3749_v21  ;;  %v3822_v21 = vld [vmem:[%s5127_s4 + $0x260] ss:$8 sps:$4 sm:$0xff]  }
  0x5b   : > { %3596 = vmatpush3.bf16.msra.mxu1 %v3750_v23  ;;  %v3830_v23 = vld [vmem:[%s5127_s4 + $0x274] ss:$8 sps:$4 sm:$0xff]  }
  0x5c   : > { %1108 = vmatpush1.bf16.msra.mxu0 %v3747_v22  ;;  %3597 = vmatprep.subr.bf16.mxu1 %v4019_v1  ;;  %v3825_v22 = vld [vmem:[%s5127_s4 + $0x2f0] ss:$8 sps:$4 sm:$0xff]  }
  0x5d   : > { %1109 = vmatprep.subr.bf16.mxu0 %v3753_v24  ;;  %v3833_v24 = vld [vmem:[%s5127_s4 + $0x4] ss:$8 sps:$4 sm:$0xff]  }
  0x5f   : > { %3598 = vmatpush3.bf16.msra.mxu1 %v3754_v26  ;;  %v3828_v26 = vld [vmem:[%s5127_s4 + $0x270] ss:$8 sps:$4 sm:$0xff]  }
  0x60   : > { %1110 = vmatpush1.bf16.msra.mxu0 %v3751_v28  ;;  %3599 = vmatprep.subr.bf16.mxu1 %v4019_v1  ;;  %v3791_v1 = vld [vmem:[%s5127_s4 + $0x294] ss:$8 sps:$4 sm:$0xff]   ;;  %v1199_v28 = vsub.s32 2, %v4216_v37 }
  0x61   : > { %1111 = vmatprep.subr.bf16.mxu0 %v3757_v29  ;;  %v1187_v29 = vld [vmem:[%s5125_s2] sm:$0x7] }
  0x62   : > { %v1196_v36 = vrot.slane %v1187_v29, %v4570_v31 }
  0x63   : > { %3600 = vmatpush3.bf16.msra.mxu1 %v3758_v32  ;;  %v1210_v32 = vld [vmem:[%s5126_s3] sm:$0x7] }
  0x64   : > { %1112 = vmatpush1.bf16.msra.mxu0 %v3755_v33  ;;  %1624 = vmatprep.subr.bf16.mxu1 %v3761_v34  ;;  %v1200_v33 = vrot.slane %v1187_v29, %v1199_v28  ;;  %v1192_v34 = vrot.slane %v1187_v29, %v4567_v30  ;;  %v1223_v35 = vrot.slane %v1210_v32, %v1199_v28 }
  0x65   : > { %1667 = vmatprep.subr.bf16.mxu0 %v3785_v38 }
  0x66   : > { %3602 = vmatmul.mubr.msk.bf16.vlgmr.msra.gmra.mrb[0].mxu1 %vm4420_vm14, %v432_v41 }
  0x67   : > { %3176 = vmatmul.mubr.msk.bf16.vlgmr.msra.gmra.mrb[0].mxu0 %vm4420_vm14, %v432_v41  ;;  %1625 = vmatpush1.bf16.msra.mxu1 %v3759_v39  ;;  %v1215_v39 = vrot.slane %v1210_v32, %v4567_v30 }
  0x68   : > { %1626 = vmatprep.subr.bf16.mxu1 %v3764_v40  ;;  %1668 = vmatpush1.bf16.msra.mxu0 %v3783_v27 }
  0x69   : > { %1669 = vmatprep.subr.bf16.mxu0 %v3791_v1  ;;  %1699 = vmatprep.mubr.bf16.mxu0 %v4021_v5  ;;  %v1219_v1 = vrot.slane %v1210_v32, %v4570_v31  ;;  %v3840_v32 = vld [vmem:[%s5127_s4 + $0x30] ss:$8 sps:$4 sm:$0xff]  }
  0x6b   : > { %1627 = vmatpush1.bf16.msra.mxu1 %v3762_v43 }
  0x6c   : > { %1628 = vmatprep.subr.bf16.mxu1 %v3767_v44  ;;  %1670 = vmatpush1.bf16.msra.mxu0 %v3789_v45 }
  0x6d   : > { %1671 = vmatprep.subr.bf16.mxu0 %v3797_v46 }
  0x6f   : > { %1629 = vmatpush1.bf16.msra.mxu1 %v3765_v47 }
  0x70   : > { %1630 = vmatprep.subr.bf16.mxu1 %v3770_v48  ;;  %1672 = vmatpush1.bf16.msra.mxu0 %v3795_v49 }
  0x71   : > { %1673 = vmatprep.subr.bf16.mxu0 %v3803_v50 }
  0x73   : > { %1631 = vmatpush1.bf16.msra.mxu1 %v3768_v51 }
  0x74   : > { %1632 = vmatprep.subr.bf16.mxu1 %v3773_v52  ;;  %1674 = vmatpush1.bf16.msra.mxu0 %v3801_v53 }
  0x75   : > { %1675 = vmatprep.subr.bf16.mxu0 %v3809_v54 }
  0x77   : > { %1633 = vmatpush1.bf16.msra.mxu1 %v3771_v55 }
  0x78   : > { %1634 = vmatprep.subr.bf16.mxu1 %v3776_v56  ;;  %1676 = vmatpush1.bf16.msra.mxu0 %v3807_v57 }
  0x79   : > { %1677 = vmatprep.subr.bf16.mxu0 %v3815_v58 }
  0x7b   : > { %1635 = vmatpush1.bf16.msra.mxu1 %v3774_v59 }
  0x7c   : > { %1636 = vmatprep.subr.bf16.mxu1 %v3779_v60  ;;  %1678 = vmatpush1.bf16.msra.mxu0 %v3813_v61 }
  0x7d   : > { %1679 = vmatprep.subr.bf16.mxu0 %v3821_v16 }
  0x7f   : > { %1637 = vmatpush1.bf16.msra.mxu1 %v3777_v63  ;;  %v3831_v63 = vld [vmem:[%s5127_s4] ss:$8 sps:$4 sm:$0xff]  }
  0x80   : > { %1638 = vmatprep.subr.bf16.mxu1 %v3782_v0  ;;  %1680 = vmatpush1.bf16.msra.mxu0 %v3819_v18 }
  0x81   : > { %1681 = vmatprep.subr.bf16.mxu0 %v3827_v20 }
  0x83   : > { %1639 = vmatpush1.bf16.msra.mxu1 %v3780_v3 }
  0x84   : > { %1640 = vmatprep.subr.bf16.mxu1 %v3788_v4  ;;  %1682 = vmatpush1.bf16.msra.mxu0 %v3825_v22  ;;  %v3837_v22 = vld [vmem:[%s5127_s4 + $0x20] ss:$8 sps:$4 sm:$0xff]  }
  0x85   : > { %1950 = vmatprep.subr.bf16.mxu0 %v3833_v24 }
  0x87   : > { %1641 = vmatpush1.bf16.msra.mxu1 %v3786_v6  ;;  %v3836_v6 = vld [vmem:[%s5127_s4 + $0x14] ss:$8 sps:$4 sm:$0xff]  }
  0x88   : > { %1642 = vmatprep.subr.bf16.mxu1 %v3794_v7 }
  0x8b   : > { %1643 = vmatpush1.bf16.msra.mxu1 %v3792_v8 }
  0x8c   : > { %1644 = vmatprep.subr.bf16.mxu1 %v3800_v9 }
  0x8f   : > { %1645 = vmatpush1.bf16.msra.mxu1 %v3798_v10 }
  0x90   : > { %1646 = vmatprep.subr.bf16.mxu1 %v3806_v11  ;;  %v3834_v11 = vld [vmem:[%s5127_s4 + $0x10] ss:$8 sps:$4 sm:$0xff]  }
  0x93   : > { %1647 = vmatpush1.bf16.msra.mxu1 %v3804_v12 }
  0x94   : > { %1648 = vmatprep.subr.bf16.mxu1 %v3812_v13 }
  0x97   : > { %1649 = vmatpush1.bf16.msra.mxu1 %v3810_v14  ;;  %v3839_v14 = vld [vmem:[%s5127_s4 + $0x24] ss:$8 sps:$4 sm:$0xff]  }
  0x98   : > { %1650 = vmatprep.subr.bf16.mxu1 %v3818_v15 }
  0x9b   : > { %1651 = vmatpush1.bf16.msra.mxu1 %v3816_v17 }
  0x9c   : > { %1652 = vmatprep.subr.bf16.mxu1 %v3824_v19 }
  0x9f   : > { %1653 = vmatpush1.bf16.msra.mxu1 %v3822_v21 }
  0xa0   : > { %1654 = vmatprep.subr.bf16.mxu1 %v3830_v23 }
  0xa3   : > { %1655 = vmatpush1.bf16.msra.mxu1 %v3828_v26  ;;  %v3842_v26 = vld [vmem:[%s5127_s4 + $0x34] ss:$8 sps:$4 sm:$0xff]  }
  0xa4   : > { %2607 = vmatprep.subr.bf16.mxu1 %v4021_v5 }
 0x139   : > { %v1174_v38 = vpop.f32.mrb[0].mxu1 }
 0x13a   : > { %v1206_v40 = vmul.f32 %v1200_v33, %v1174_v38  ;;  %v1131_v27 = vpop.f32.mrb[0].mxu0  ;;  %v3603_v41 = vpop.f32.mrb[1].mxu1  ;;  %v3851_v38 = vld [vmem:[%s5127_s4 + $0x64] ss:$8 sps:$4 sm:$0xff]  }
 0x13b   : > { %v1204_v37 = vmul.f32 %v1192_v34, %v1131_v27  ;;  %v1133_v43 = vpop.f32.mrb[1].mxu0  ;;  %v1177_v44 = vpop.f32.mrb[2].mxu1  ;;  %v3852_v27 = vld [vmem:[%s5127_s4 + $0x70] ss:$8 sps:$4 sm:$0xff]   ;;  %v3857_v41 = vld [vmem:[%s5127_s4 + $0x84] ss:$8 sps:$4 sm:$0xff]  }
 0x13c   : > { %v1229_v45 = vadd.f32 %v1223_v35, %v1206_v40  ;;  %v1205_v46 = vmul.f32 %v1196_v36, %v1133_v43  ;;  %v1209_v47 = vmul.f32 %v1200_v33, %v1177_v44  ;;  %v1135_v48 = vpop.f32.mrb[2].mxu0  ;;  %v3604_v49 = vpop.f32.mrb[3].mxu1  ;;  %v3845_v33 = vld [vmem:[%s5127_s4 + $0x44] ss:$8 sps:$4 sm:$0xff]   ;;  %v3854_v40 = vld [vmem:[%s5127_s4 + $0x74] ss:$8 sps:$4 sm:$0xff]  }
 0x13d   : > { %v1227_v50 = vadd.f32 %v1215_v39, %v1204_v37  ;;  %v1207_v51 = vmul.f32 %v1192_v34, %v1135_v48  ;;  %v1137_v52 = vpop.f32.mrb[3].mxu0  ;;  %v3843_v34 = vld [vmem:[%s5127_s4 + $0x40] ss:$8 sps:$4 sm:$0xff]   ;;  %v3860_v37 = vld [vmem:[%s5127_s4 + $0x94] ss:$8 sps:$4 sm:$0xff]  }
 0x13e   : > { %v1228_v53 = vadd.f32 %v1219_v1, %v1205_v46  ;;  %v1232_v54 = vadd.f32 %v1223_v35, %v1209_v47  ;;  %v1208_v55 = vmul.f32 %v1196_v36, %v1137_v52  ;;  %v1235_v57 = vmax.f32 %v1229_v45, 0.0  ;;  %v3848_v35 = vld [vmem:[%s5127_s4 + $0x54] ss:$8 sps:$4 sm:$0xff]   ;;  %v3846_v36 = vld [vmem:[%s5127_s4 + $0x50] ss:$8 sps:$4 sm:$0xff]  }
 0x13f   : > { %v1230_v56 = vadd.f32 %v1215_v39, %v1207_v51  ;;  %v1233_v60 = vmax.f32 %v1227_v50, 0.0  ;;  %v3849_v39 = vld [vmem:[%s5127_s4 + $0x60] ss:$8 sps:$4 sm:$0xff]   ;;  %v3858_v43 = vld [vmem:[%s5127_s4 + $0x90] ss:$8 sps:$4 sm:$0xff]  }
 0x140   : > { %v1238_v58 = vmax.f32 %v1232_v54, 0.0  ;;  %v1231_v59 = vadd.f32 %v1219_v1, %v1208_v55  ;;  %v1234_v0 = vmax.f32 %v1228_v53, 0.0  ;;  %v3855_v1 = vld [vmem:[%s5127_s4 + $0x80] ss:$8 sps:$4 sm:$0xff]   ;;  %v3863_v44 = vld [vmem:[%s5127_s4 + $0xa4] ss:$8 sps:$4 sm:$0xff]  }
 0x141   : > { %v1236_v61 = vmax.f32 %v1230_v56, 0.0  ;;  %v3861_v45 = vld [vmem:[%s5127_s4 + $0xa0] ss:$8 sps:$4 sm:$0xff]   ;;  %v3866_v46 = vld [vmem:[%s5127_s4 + $0xb4] ss:$8 sps:$4 sm:$0xff]  }
 0x142   : > { %v4582_v3 = vpack.c.bf16 %v1238_v58, %v1235_v57  ;;  %v1237_v4 = vmax.f32 %v1231_v59, 0.0  ;;  %v3864_v47 = vld [vmem:[%s5127_s4 + $0xb0] ss:$8 sps:$4 sm:$0xff]   ;;  %v3869_v48 = vld [vmem:[%s5127_s4 + $0xc4] ss:$8 sps:$4 sm:$0xff]  }
 0x143   : > { %v4587_v7 = vpack.c.bf16 %v1236_v61, %v1233_v60  ;;  %v3867_v49 = vld [vmem:[%s5127_s4 + $0xc0] ss:$8 sps:$4 sm:$0xff]   ;;  %v3872_v50 = vld [vmem:[%s5127_s4 + $0xd4] ss:$8 sps:$4 sm:$0xff]   ;;  %v3870_v51 = vld [vmem:[%s5127_s4 + $0xd0] ss:$8 sps:$4 sm:$0xff]  }
 0x144   : > { %v1260_v8 = vshll.u32 %v4582_v3, 16  ;;  %1700 = vmatmul.mubr.bf16.vlgmr.msra.gmra.mrb[4].mxu0 %v4582_v3  ;;  %v1240_v9 = vpack.c.bf16 %v1237_v4, %v1234_v0  ;;  %v1257_v12 = vshrl.u32 %v4582_v3, 16  ;;  %v3875_v52 = vld [vmem:[%s5127_s4 + $0xe4] ss:$8 sps:$4 sm:$0xff]   ;;  %v3873_v53 = vld [vmem:[%s5127_s4 + $0xe0] ss:$8 sps:$4 sm:$0xff]  }
 0x145   : > { %v1246_v10 = vshll.u32 %v4587_v7, 16  ;;  %1951 = vmatpush1.bf16.msra.mxu0 %v3831_v63  ;;  %v1243_v17 = vshrl.u32 %v4587_v7, 16  ;;  %v3878_v54 = vld [vmem:[%s5127_s4 + $0xf4] ss:$8 sps:$4 sm:$0xff]   ;;  %v3876_v56 = vld [vmem:[%s5127_s4 + $0xf0] ss:$8 sps:$4 sm:$0xff]  }
 0x146   : > { %v1250_v13 = vshrl.u32 %v1240_v9, 16  ;;  %1656 = vmatprep.mubr.bf16.mxu1 %v1240_v9  ;;  %1952 = vmatprep.subr.bf16.mxu0 %v3836_v6  ;;  %v1253_v15 = vshll.u32 %v1240_v9, 16  ;;  %v1276_v16 = vrot.slane %v1260_v8, 1  ;;  %v3881_v57 = vld [vmem:[%s5127_s4 + $0x104] ss:$8 sps:$4 sm:$0xff]  }
 0x147   : > { %1657 = vmatmul.mubr.bf16.vlgmr.msra.gmra.mrb[4].mxu1 %v4587_v7  ;;  %v1272_v18 = vrot.slane %v1246_v10, 1  ;;  %v1245_v55 = vrot.slane %v1243_v17, 7  ;;  %v3879_v59 = vld [vmem:[%s5127_s4 + $0x100] ss:$8 sps:$4 sm:$0xff]   ;;  %v3884_v60 = vld [vmem:[%s5127_s4 + $0x114] ss:$8 sps:$4 sm:$0xff]  }
 0x148   : > { %v1252_v19 = vrot.slane %v1250_v13, 7  ;;  %v1274_v20 = vrot.slane %v1253_v15, 1  ;;  %v4607_v21 = vor.u32 %v1276_v16, %v1257_v12  ;;  %v3882_v63 = vld [vmem:[%s5127_s4 + $0x110] ss:$8 sps:$4 sm:$0xff]   ;;  %v3887_v0 = vld [vmem:[%s5127_s4 + $0x124] ss:$8 sps:$4 sm:$0xff]  }
 0x149   : > { %1953 = vmatpush1.bf16.msra.mxu0 %v3834_v11  ;;  %v4612_v23 = vor.u32 %v1272_v18, %v1243_v17  ;;  %v1248_v58 = vor.u32 %v1246_v10, %v1245_v55  ;;  %v3885_v4 = vld [vmem:[%s5127_s4 + $0x120] ss:$8 sps:$4 sm:$0xff]   ;;  %v3890_v6 = vld [vmem:[%s5127_s4 + $0x134] ss:$8 sps:$4 sm:$0xff]   ;;  %v3888_v7 = vld [vmem:[%s5127_s4 + $0x130] ss:$8 sps:$4 sm:$0xff]  }
 0x14a   : > { %1954 = vmatprep.subr.bf16.mxu0 %v3839_v14  ;;  %v1255_v24 = vor.u32 %v1253_v15, %v1252_v19  ;;  %v4617_v28 = vor.u32 %v1274_v20, %v1250_v13  ;;  %v3893_v9 = vld [vmem:[%s5127_s4 + $0x144] ss:$8 sps:$4 sm:$0xff]   ;;  %v3891_v10 = vld [vmem:[%s5127_s4 + $0x140] ss:$8 sps:$4 sm:$0xff]   ;;  %v3896_v11 = vld [vmem:[%s5127_s4 + $0x154] ss:$8 sps:$4 sm:$0xff]  }
 0x14b   : > { %v1266_v61 = vsel %vm4288_vm7, 0, %v1248_v58  ;;  %v3894_v13 = vld [vmem:[%s5127_s4 + $0x150] ss:$8 sps:$4 sm:$0xff]   ;;  %v3899_v14 = vld [vmem:[%s5127_s4 + $0x164] ss:$8 sps:$4 sm:$0xff]   ;;  %v1259_v17 = vrot.slane %v1257_v12, 7 }
 0x14c   : > { %v1267_v29 = vsel %vm4288_vm7, 0, %v1255_v24  ;;  %v3897_v15 = vld [vmem:[%s5127_s4 + $0x160] ss:$8 sps:$4 sm:$0xff]   ;;  %v3902_v16 = vld [vmem:[%s5127_s4 + $0x174] ss:$8 sps:$4 sm:$0xff]  }
 0x14d   : > { %1955 = vmatpush1.bf16.msra.mxu0 %v3837_v22  ;;  %3322 = vmatprep.mubr.msk.bf16.mxu0 %vm4297_vm8, %v1267_v29  ;;  %v3900_v18 = vld [vmem:[%s5127_s4 + $0x170] ss:$8 sps:$4 sm:$0xff]   ;;  %v3975_v19 = vld [vmem:[%s5130_s7 + $0x60] sm:$0xff]   ;;  %v1262_v22 = vor.u32 %v1260_v8, %v1259_v17  ;;  %v3976_v12 = vld [vmem:[%s5130_s7 + $0x68] sm:$0xff]   ;;  %v1282_v29 = vsel %vm4376_vm13, %v4617_v28, 0 }
 0x14e   : > { %1956 = vmatprep.subr.bf16.mxu0 %v3842_v26  ;;  %v3905_v20 = vld [vmem:[%s5127_s4 + $0x304] ss:$8 sps:$4 sm:$0xff]   ;;  %2608 = vmatpush1.bf16.msra.mxu1 %v3975_v19  ;;  %v3903_v24 = vld [vmem:[%s5127_s4 + $0x300] ss:$8 sps:$4 sm:$0xff]   ;;  %v3908_v26 = vld [vmem:[%s5127_s4 + $0x314] ss:$8 sps:$4 sm:$0xff]  }
 0x14f   : > { %2609 = vmatprep.subr.bf16.mxu1 %v4021_v5  ;;  %v1268_v3 = vsel %vm4288_vm7, 0, %v1262_v22  ;;  %v3977_v8 = vld [vmem:[%s5130_s7 + $0x70] sm:$0xff]   ;;  %v3978_v28 = vld [vmem:[%s5130_s7 + $0x78] sm:$0xff]   ;;  %v3939_v58 = vld [vmem:[%s5127_s4 + $0x3c0] ss:$8 sps:$4 sm:$0xff]  }
 0x150   : > { %v3938_v55 = vld [vmem:[%s5127_s4 + $0x3b4] ss:$8 sps:$4 sm:$0xff]   ;;  %v3963_v17 = vld [vmem:[%s5127_s4 + $0x440] ss:$8 sps:$4 sm:$0xff]   ;;  %v3966_v19 = vld [vmem:[%s5127_s4 + $0x450] ss:$8 sps:$4 sm:$0xff]  }
 0x151   : > { %1957 = vmatpush1.bf16.msra.mxu0 %v3840_v32  ;;  %v3906_v32 = vld [vmem:[%s5127_s4 + $0x310] ss:$8 sps:$4 sm:$0xff]   ;;  %v3969_v22 = vld [vmem:[%s5127_s4 + $0x460] ss:$8 sps:$4 sm:$0xff]  }
 0x152   : > { %1958 = vmatprep.subr.bf16.mxu0 %v3845_v33  ;;  %2610 = vmatpush1.bf16.msra.mxu1 %v3976_v12  ;;  %v3911_v33 = vld [vmem:[%s5127_s4 + $0x324] ss:$8 sps:$4 sm:$0xff]   ;;  %v3974_v12 = vld [vmem:[%s5127_s4 + $0x474] ss:$8 sps:$4 sm:$0xff]  }
 0x153   : > { %2611 = vmatprep.subr.bf16.mxu1 %v4021_v5 }
 0x155   : > { %1959 = vmatpush1.bf16.msra.mxu0 %v3843_v34  ;;  %v3909_v34 = vld [vmem:[%s5127_s4 + $0x320] ss:$8 sps:$4 sm:$0xff]  }
 0x156   : > { %1960 = vmatprep.subr.bf16.mxu0 %v3848_v35  ;;  %2612 = vmatpush1.bf16.msra.mxu1 %v3977_v8  ;;  %v3914_v35 = vld [vmem:[%s5127_s4 + $0x334] ss:$8 sps:$4 sm:$0xff]  }
 0x157   : > { %2613 = vmatprep.subr.bf16.mxu1 %v4021_v5 }
 0x159   : > { %1961 = vmatpush1.bf16.msra.mxu0 %v3846_v36  ;;  %v3979_v36 = vld [vmem:[%s5130_s7 + $0x80] sm:$0xff]  }
 0x15a   : > { %1962 = vmatprep.subr.bf16.mxu0 %v3851_v38  ;;  %2614 = vmatpush1.bf16.msra.mxu1 %v3978_v28  ;;  %v3912_v38 = vld [vmem:[%s5127_s4 + $0x330] ss:$8 sps:$4 sm:$0xff]  }
 0x15b   : > { %2615 = vmatprep.subr.bf16.mxu1 %v4021_v5  ;;  %v3985_v28 = vld [vmem:[%s5130_s7 + $0xb0] sm:$0xff]  }
 0x15d   : > { %1963 = vmatpush1.bf16.msra.mxu0 %v3849_v39  ;;  %v3917_v39 = vld [vmem:[%s5127_s4 + $0x344] ss:$8 sps:$4 sm:$0xff]  }
 0x15e   : > { %1964 = vmatprep.subr.bf16.mxu0 %v3854_v40  ;;  %2616 = vmatpush1.bf16.msra.mxu1 %v3979_v36  ;;  %v3980_v40 = vld [vmem:[%s5130_s7 + $0x88] sm:$0xff]  }
 0x15f   : > { %2617 = vmatprep.subr.bf16.mxu1 %v4021_v5 }
 0x161   : > { %1965 = vmatpush1.bf16.msra.mxu0 %v3852_v27  ;;  %v3915_v27 = vld [vmem:[%s5127_s4 + $0x340] ss:$8 sps:$4 sm:$0xff]  }
 0x162   : > { %1966 = vmatprep.subr.bf16.mxu0 %v3857_v41  ;;  %v3920_v41 = vld [vmem:[%s5127_s4 + $0x354] ss:$8 sps:$4 sm:$0xff]   ;;  %2618 = vmatpush1.bf16.msra.mxu1 %v3980_v40 }
 0x163   : > { %2619 = vmatprep.subr.bf16.mxu1 %v4021_v5 }
 0x165   : > { %1967 = vmatpush1.bf16.msra.mxu0 %v3855_v1  ;;  %v3981_v1 = vld [vmem:[%s5130_s7 + $0x90] sm:$0xff]  }
 0x166   : > { %1968 = vmatprep.subr.bf16.mxu0 %v3860_v37  ;;  %v3918_v37 = vld [vmem:[%s5127_s4 + $0x350] ss:$8 sps:$4 sm:$0xff]   ;;  %2620 = vmatpush1.bf16.msra.mxu1 %v3981_v1 }
 0x167   : > { %2621 = vmatprep.subr.bf16.mxu1 %v4021_v5 }
 0x169   : > { %1969 = vmatpush1.bf16.msra.mxu0 %v3858_v43  ;;  %v3923_v43 = vld [vmem:[%s5127_s4 + $0x364] ss:$8 sps:$4 sm:$0xff]  }
 0x16a   : > { %1970 = vmatprep.subr.bf16.mxu0 %v3863_v44  ;;  %v3982_v44 = vld [vmem:[%s5130_s7 + $0x98] sm:$0xff]  }
 0x16b   : > { %2622 = vmatpush1.bf16.msra.mxu1 %v3982_v44 }
 0x16c   : > { %2623 = vmatprep.subr.bf16.mxu1 %v4021_v5 }
 0x16d   : > { %1971 = vmatpush1.bf16.msra.mxu0 %v3861_v45  ;;  %v3921_v45 = vld [vmem:[%s5127_s4 + $0x360] ss:$8 sps:$4 sm:$0xff]  }
 0x16e   : > { %1972 = vmatprep.subr.bf16.mxu0 %v3866_v46  ;;  %v3926_v46 = vld [vmem:[%s5127_s4 + $0x374] ss:$8 sps:$4 sm:$0xff]  }
 0x171   : > { %1973 = vmatpush1.bf16.msra.mxu0 %v3864_v47  ;;  %v3983_v47 = vld [vmem:[%s5130_s7 + $0xa0] sm:$0xff]  }
 0x172   : > { %1974 = vmatprep.subr.bf16.mxu0 %v3869_v48  ;;  %v3924_v48 = vld [vmem:[%s5127_s4 + $0x370] ss:$8 sps:$4 sm:$0xff]   ;;  %2624 = vmatpush1.bf16.msra.mxu1 %v3983_v47 }
 0x173   : > { %2625 = vmatprep.subr.bf16.mxu1 %v4021_v5 }
 0x175   : > { %1975 = vmatpush1.bf16.msra.mxu0 %v3867_v49  ;;  %v3929_v49 = vld [vmem:[%s5127_s4 + $0x384] ss:$8 sps:$4 sm:$0xff]  }
 0x176   : > { %1976 = vmatprep.subr.bf16.mxu0 %v3872_v50  ;;  %v3927_v50 = vld [vmem:[%s5127_s4 + $0x380] ss:$8 sps:$4 sm:$0xff]  }
 0x179   : > { %1977 = vmatpush1.bf16.msra.mxu0 %v3870_v51  ;;  %v3932_v51 = vld [vmem:[%s5127_s4 + $0x394] ss:$8 sps:$4 sm:$0xff]  }
 0x17a   : > { %1978 = vmatprep.subr.bf16.mxu0 %v3875_v52  ;;  %v3930_v52 = vld [vmem:[%s5127_s4 + $0x390] ss:$8 sps:$4 sm:$0xff]  }
 0x17d   : > { %1979 = vmatpush1.bf16.msra.mxu0 %v3873_v53  ;;  %v3935_v53 = vld [vmem:[%s5127_s4 + $0x3a4] ss:$8 sps:$4 sm:$0xff]  }
 0x17e   : > { %1980 = vmatprep.subr.bf16.mxu0 %v3878_v54  ;;  %v3933_v54 = vld [vmem:[%s5127_s4 + $0x3a0] ss:$8 sps:$4 sm:$0xff]  }
 0x181   : > { %1981 = vmatpush1.bf16.msra.mxu0 %v3876_v56  ;;  %v3936_v56 = vld [vmem:[%s5127_s4 + $0x3b0] ss:$8 sps:$4 sm:$0xff]  }
 0x182   : > { %1993 = vmatprep.subr.bf16.mxu0 %v3881_v57  ;;  %v3941_v57 = vld [vmem:[%s5127_s4 + $0x3c4] ss:$8 sps:$4 sm:$0xff]  }
 0x184   : > { %3323 = vmatmul.mubr.msk.bf16.vlgmr.msra.gmra.mrb[4].mxu0 %vm4297_vm8, %v1266_v61  ;;  %v3947_v61 = vld [vmem:[%s5127_s4 + $0x3e4] ss:$8 sps:$4 sm:$0xff]  }
 0x185   : > { %1994 = vmatpush1.bf16.msra.mxu0 %v3879_v59  ;;  %2025 = vmatprep.mubr.bf16.mxu0 %v4021_v5  ;;  %v3944_v59 = vld [vmem:[%s5127_s4 + $0x3d4] ss:$8 sps:$4 sm:$0xff]  }
 0x186   : > { %1995 = vmatprep.subr.bf16.mxu0 %v3884_v60  ;;  %v3942_v60 = vld [vmem:[%s5127_s4 + $0x3d0] ss:$8 sps:$4 sm:$0xff]  }
 0x189   : > { %1996 = vmatpush1.bf16.msra.mxu0 %v3882_v63  ;;  %v3945_v63 = vld [vmem:[%s5127_s4 + $0x3e0] ss:$8 sps:$4 sm:$0xff]  }
 0x18a   : > { %1997 = vmatprep.subr.bf16.mxu0 %v3887_v0  ;;  %v3950_v0 = vld [vmem:[%s5127_s4 + $0x3f4] ss:$8 sps:$4 sm:$0xff]  }
 0x18d   : > { %1998 = vmatpush1.bf16.msra.mxu0 %v3885_v4  ;;  %v3948_v4 = vld [vmem:[%s5127_s4 + $0x3f0] ss:$8 sps:$4 sm:$0xff]  }
 0x18e   : > { %1999 = vmatprep.subr.bf16.mxu0 %v3890_v6  ;;  %v3953_v6 = vld [vmem:[%s5127_s4 + $0x404] ss:$8 sps:$4 sm:$0xff]  }
 0x191   : > { %2000 = vmatpush1.bf16.msra.mxu0 %v3888_v7  ;;  %v3951_v7 = vld [vmem:[%s5127_s4 + $0x400] ss:$8 sps:$4 sm:$0xff]  }
 0x192   : > { %2001 = vmatprep.subr.bf16.mxu0 %v3893_v9  ;;  %v3956_v9 = vld [vmem:[%s5127_s4 + $0x414] ss:$8 sps:$4 sm:$0xff]  }
 0x195   : > { %2002 = vmatpush1.bf16.msra.mxu0 %v3891_v10  ;;  %v1281_v10 = vsel %vm4376_vm13, %v4612_v23, 0  ;;  %v3957_v23 = vld [vmem:[%s5127_s4 + $0x420] ss:$8 sps:$4 sm:$0xff]  }
 0x196   : > { %2003 = vmatprep.subr.bf16.mxu0 %v3896_v11  ;;  %v3954_v11 = vld [vmem:[%s5127_s4 + $0x410] ss:$8 sps:$4 sm:$0xff]  }
 0x199   : > { %2004 = vmatpush1.bf16.msra.mxu0 %v3894_v13  ;;  %v3959_v13 = vld [vmem:[%s5127_s4 + $0x424] ss:$8 sps:$4 sm:$0xff]  }
 0x19a   : > { %2005 = vmatprep.subr.bf16.mxu0 %v3899_v14  ;;  %v3962_v14 = vld [vmem:[%s5127_s4 + $0x434] ss:$8 sps:$4 sm:$0xff]  }
 0x19d   : > { %2006 = vmatpush1.bf16.msra.mxu0 %v3897_v15  ;;  %v3960_v15 = vld [vmem:[%s5127_s4 + $0x430] ss:$8 sps:$4 sm:$0xff]  }
 0x19e   : > { %2007 = vmatprep.subr.bf16.mxu0 %v3902_v16  ;;  %v3965_v16 = vld [vmem:[%s5127_s4 + $0x444] ss:$8 sps:$4 sm:$0xff]  }
 0x1a1   : > { %2008 = vmatpush1.bf16.msra.mxu0 %v3900_v18  ;;  %v3968_v18 = vld [vmem:[%s5127_s4 + $0x454] ss:$8 sps:$4 sm:$0xff]  }
 0x1a2   : > { %2325 = vmatprep.subr.bf16.mxu0 %v3905_v20  ;;  %v3971_v20 = vld [vmem:[%s5127_s4 + $0x464] ss:$8 sps:$4 sm:$0xff]  }
 0x1a4   : > { %3324 = vmatmul.mubr.msk.bf16.vlgmr.msra.gmra.mrb[4].mxu0 %vm4297_vm8, %v1268_v3 }
 0x1a5   : > { %2326 = vmatpush1.bf16.msra.mxu0 %v3903_v24  ;;  %3421 = vmatprep.mubr.msk.bf16.mxu0 %vm4420_vm14, %v1282_v29  ;;  %v3972_v24 = vld [vmem:[%s5127_s4 + $0x470] ss:$8 sps:$4 sm:$0xff]  }
 0x1a6   : > { %2327 = vmatprep.subr.bf16.mxu0 %v3908_v26  ;;  %v1283_v26 = vsel %vm4376_vm13, %v4607_v21, 0  ;;  %v3986_v21 = vld [vmem:[%s5130_s7 + $0xb8] sm:$0xff]  }
 0x1a9   : > { %2328 = vmatpush1.bf16.msra.mxu0 %v3906_v32 }
 0x1aa   : > { %2329 = vmatprep.subr.bf16.mxu0 %v3911_v33  ;;  %v3984_v33 = vld [vmem:[%s5130_s7 + $0xa8] sm:$0xff]  }
 0x1ab   : > { %2626 = vmatpush1.bf16.msra.mxu1 %v3984_v33  ;;  %v4000_v33 = vld [vmem:[%s5130_s7 + $0xc8] sm:$0xff]  }
 0x1ac   : > { %2627 = vmatprep.subr.bf16.mxu1 %v4021_v5 }
 0x1ad   : > { %2330 = vmatpush1.bf16.msra.mxu0 %v3909_v34  ;;  %v2415_v34 = vld [vmem:[%s5128_s5] sm:$0x3] }
 0x1ae   : > { %2331 = vmatprep.subr.bf16.mxu0 %v3914_v35  ;;  %v2431_v35 = vld [vmem:[%s5129_s6] sm:$0x3]  ;;  %v2420_v36 = vrot.slane %v2415_v34, %v4567_v30 }
 0x1af   : > { %2628 = vmatpush1.bf16.msra.mxu1 %v3985_v28  ;;  %v4003_v28 = vld [vmem:[%s5130_s7 + $0xe0] sm:$0xff]  }
 0x1b0   : > { %2629 = vmatprep.subr.bf16.mxu1 %v4021_v5 }
 0x1b1   : > { %2332 = vmatpush1.bf16.msra.mxu0 %v3912_v38 }
 0x1b2   : > { %2333 = vmatprep.subr.bf16.mxu0 %v3917_v39  ;;  %v2424_v39 = vrot.slane %v2415_v34, %v4570_v31  ;;  %v4005_v34 = vld [vmem:[%s5130_s7 + $0xf0] sm:$0xff]  }
 0x1b3   : > { %2630 = vmatpush1.bf16.msra.mxu1 %v3986_v21  ;;  %v4004_v21 = vld [vmem:[%s5130_s7 + $0xe8] sm:$0xff]  }
 0x1b4   : > { %2723 = vmatprep.subr.bf16.mxu1 %v4021_v5 }
 0x1b5   : > { %2334 = vmatpush1.bf16.msra.mxu0 %v3915_v27  ;;  %v2436_v27 = vrot.slane %v2431_v35, %v4567_v30 }
 0x1b6   : > { %2335 = vmatprep.subr.bf16.mxu0 %v3920_v41 }
 0x1b9   : > { %2336 = vmatpush1.bf16.msra.mxu0 %v3918_v37  ;;  %v2440_v37 = vrot.slane %v2431_v35, %v4570_v31  ;;  %v4006_v35 = vld [vmem:[%s5130_s7 + $0xf8] sm:$0xff]  }
 0x1ba   : > { %2337 = vmatprep.subr.bf16.mxu0 %v3923_v43 }
 0x1bd   : > { %2338 = vmatpush1.bf16.msra.mxu0 %v3921_v45 }
 0x1be   : > { %2339 = vmatprep.subr.bf16.mxu0 %v3926_v46 }
 0x1c1   : > { %2340 = vmatpush1.bf16.msra.mxu0 %v3924_v48 }
 0x1c2   : > { %2341 = vmatprep.subr.bf16.mxu0 %v3929_v49 }
 0x1c5   : > { %2342 = vmatpush1.bf16.msra.mxu0 %v3927_v50 }
 0x1c6   : > { %2343 = vmatprep.subr.bf16.mxu0 %v3932_v51 }
 0x1c9   : > { %2344 = vmatpush1.bf16.msra.mxu0 %v3930_v52 }
 0x1ca   : > { %2345 = vmatprep.subr.bf16.mxu0 %v3935_v53 }
 0x1cd   : > { %2346 = vmatpush1.bf16.msra.mxu0 %v3933_v54 }
 0x1ce   : > { %2347 = vmatprep.subr.bf16.mxu0 %v3938_v55 }
 0x1d1   : > { %2348 = vmatpush1.bf16.msra.mxu0 %v3936_v56 }
 0x1d2   : > { %2349 = vmatprep.subr.bf16.mxu0 %v3941_v57 }
 0x1d5   : > { %2350 = vmatpush1.bf16.msra.mxu0 %v3939_v58 }
 0x1d6   : > { %2351 = vmatprep.subr.bf16.mxu0 %v3944_v59  ;;  %v3987_v59 = vld [vmem:[%s5130_s7] sm:$0xff]  }
 0x1d9   : > { %2352 = vmatpush1.bf16.msra.mxu0 %v3942_v60 }
 0x1da   : > { %2353 = vmatprep.subr.bf16.mxu0 %v3947_v61  ;;  %v3988_v61 = vld [vmem:[%s5130_s7 + $0x8] sm:$0xff]  }
 0x1dd   : > { %2354 = vmatpush1.bf16.msra.mxu0 %v3945_v63 }
 0x1de   : > { %2355 = vmatprep.subr.bf16.mxu0 %v3950_v0 }
 0x1e1   : > { %2356 = vmatpush1.bf16.msra.mxu0 %v3948_v4 }
 0x1e2   : > { %2368 = vmatprep.subr.bf16.mxu0 %v3953_v6 }
 0x1e4   : > { %3422 = vmatmul.mubr.msk.bf16.vlgmr.msra.gmra.mrb[4].mxu0 %vm4420_vm14, %v1281_v10  ;;  %v3990_v10 = vld [vmem:[%s5130_s7 + $0x18] sm:$0xff]  }
 0x1e5   : > { %2369 = vmatpush1.bf16.msra.mxu0 %v3951_v7  ;;  %2400 = vmatprep.mubr.bf16.mxu0 %v4021_v5  ;;  %v3989_v7 = vld [vmem:[%s5130_s7 + $0x10] sm:$0xff]  }
 0x1e6   : > { %2370 = vmatprep.subr.bf16.mxu0 %v3956_v9 }
 0x1e9   : > { %2371 = vmatpush1.bf16.msra.mxu0 %v3954_v11  ;;  %v3991_v11 = vld [vmem:[%s5130_s7 + $0x20] sm:$0xff]  }
 0x1ea   : > { %2372 = vmatprep.subr.bf16.mxu0 %v3959_v13  ;;  %v3992_v13 = vld [vmem:[%s5130_s7 + $0x28] sm:$0xff]  }
 0x1ed   : > { %2373 = vmatpush1.bf16.msra.mxu0 %v3957_v23  ;;  %v3993_v23 = vld [vmem:[%s5130_s7 + $0x30] sm:$0xff]  }
 0x1ee   : > { %2374 = vmatprep.subr.bf16.mxu0 %v3962_v14  ;;  %v3994_v14 = vld [vmem:[%s5130_s7 + $0x38] sm:$0xff]  }
 0x1f1   : > { %2375 = vmatpush1.bf16.msra.mxu0 %v3960_v15  ;;  %v3995_v15 = vld [vmem:[%s5130_s7 + $0x40] sm:$0xff]  }
 0x1f2   : > { %2376 = vmatprep.subr.bf16.mxu0 %v3965_v16  ;;  %v3996_v16 = vld [vmem:[%s5130_s7 + $0x48] sm:$0xff]  }
 0x1f5   : > { %2377 = vmatpush1.bf16.msra.mxu0 %v3963_v17 }
 0x1f6   : > { %2378 = vmatprep.subr.bf16.mxu0 %v3968_v18  ;;  %v3997_v18 = vld [vmem:[%s5130_s7 + $0x50] sm:$0xff]  }
 0x1f9   : > { %2379 = vmatpush1.bf16.msra.mxu0 %v3966_v19 }
 0x1fa   : > { %2380 = vmatprep.subr.bf16.mxu0 %v3971_v20 }
 0x1fd   : > { %2381 = vmatpush1.bf16.msra.mxu0 %v3969_v22  ;;  %v3998_v22 = vld [vmem:[%s5130_s7 + $0x58] sm:$0xff]  }
 0x1fe   : > { %2382 = vmatprep.subr.bf16.mxu0 %v3974_v12 }
 0x201   : > { %2383 = vmatpush1.bf16.msra.mxu0 %v3972_v24 }
 0x204   : > { %3423 = vmatmul.mubr.msk.bf16.vlgmr.msra.gmra.mrb[4].mxu0 %vm4420_vm14, %v1283_v26 }
 0x21a   : > { %v1658_v3 = vpop.f32.mrb[4].mxu1 }
 0x21b   : > { %v1660_v8 = vpop.f32.mrb[5].mxu1 }
 0x21c   : > { %v1662_v29 = vpop.f32.mrb[6].mxu1 }
 0x21d   : > { %v1664_v32 = vpop.f32.mrb[7].mxu1 }
 0x2d7   : > { %v2402_v38 = vpop.f32.mrb[4].mxu0 }
 0x2d8   : > { %v3605_v40 = vadd.f32 %v2402_v38, %v1658_v3  ;;  %v2404_v41 = vpop.f32.mrb[5].mxu0  ;;  %v3999_v3 = vld [vmem:[%s5130_s7 + $0xc0] sm:$0xff]   ;;  %v4008_v38 = vld [vmem:[%s5130_s7 + $0x108] sm:$0xff]  }
 0x2d9   : > { %v3606_v1 = vadd.f32 %v2404_v41, %v1660_v8  ;;  %v2406_v43 = vpop.f32.mrb[6].mxu0 }
 0x2da   : > { %v2427_v44 = vmul.f32 %v3605_v40, %v2420_v36  ;;  %v3607_v45 = vadd.f32 %v2406_v43, %v1662_v29  ;;  %v2408_v46 = vpop.f32.mrb[7].mxu0 }
 0x2db   : > { %v2428_v47 = vmul.f32 %v3606_v1, %v2424_v39  ;;  %v3608_v48 = vadd.f32 %v2408_v46, %v1664_v32 }
 0x2dc   : > { %v2443_v49 = vadd.f32 %v2436_v27, %v2427_v44  ;;  %v2429_v50 = vmul.f32 %v3607_v45, %v2420_v36  ;;  %v4007_v36 = vld [vmem:[%s5130_s7 + $0x100] sm:$0xff]  }
 0x2dd   : > { %v2444_v51 = vadd.f32 %v2440_v37, %v2428_v47  ;;  %v2430_v52 = vmul.f32 %v3608_v48, %v2424_v39  ;;  %v4009_v39 = vld [vmem:[%s5130_s7 + $0x110] sm:$0xff]   ;;  %v3514_v44 = vld [vmem:[%s5132_s9] ss:$0 sm:$0xff] }
 0x2de   : > { %v2445_v53 = vadd.f32 %v2436_v27, %v2429_v50  ;;  %v2447_v55 = vmax.f32 %v2443_v49, 0.0  ;;  %v4010_v27 = vld [vmem:[%s5130_s7 + $0x118] sm:$0xff]  }
 0x2df   : > { %v2446_v54 = vadd.f32 %v2440_v37, %v2430_v52  ;;  %v2448_v57 = vmax.f32 %v2444_v51, 0.0  ;;  %v3513_v37 = vld [vmem:[%s5131_s8] ss:$0 sm:$0xff] }
 0x2e0   : > { %v2449_v56 = vmax.f32 %v2445_v53, 0.0 }
 0x2e1   : > { %v2450_v30 = vmax.f32 %v2446_v54, 0.0 }
 0x2e2   : > { %v4979_v58 = vpack.c.bf16 %v2449_v56, %v2447_v55 }
 0x2e3   : > { %v2452_v31 = vpack.c.bf16 %v2450_v30, %v2448_v57 }
 0x2e4   : > { %v2454_v17 = vshrl.u32 %v4979_v58, 16  ;;  %v2457_v12 = vshll.u32 %v4979_v58, 16 }
 0x2e5   : > { %3460 = vmatprep.mubr.msk.bf16.mxu1 %vm2604_vm15, %v2452_v31  ;;  %v2461_v60 = vshrl.u32 %v2452_v31, 16  ;;  %v2464_v0 = vshll.u32 %v2452_v31, 16 }
 0x2e6   : > { %2640 = vmatmul.mubr.bf16.vlgmr.msra.gmra.mrb[8].mxu1 %v4979_v58  ;;  %v2456_v20 = vrot.slane %v2454_v17, 7  ;;  %v2473_v40 = vrot.slane %v2457_v12, 1 }
 0x2e7   : > { %2724 = vmatpush1.bf16.msra.mxu1 %v3987_v59  ;;  %v2463_v63 = vrot.slane %v2461_v60, 7  ;;  %v2475_v19 = vrot.slane %v2464_v0, 1 }
 0x2e8   : > { %2725 = vmatprep.subr.bf16.mxu1 %v4021_v5  ;;  %v2459_v26 = vor.u32 %v2457_v12, %v2456_v20  ;;  %v2474_v41 = vor.u32 %v2473_v40, %v2454_v17 }
 0x2e9   : > { %v2466_v4 = vor.u32 %v2464_v0, %v2463_v63  ;;  %v2476_v24 = vor.u32 %v2475_v19, %v2461_v60 }
 0x2ea   : > { %v2469_v29 = vsel %vm4288_vm7, 0, %v2459_v26  ;;  %v2479_v1 = vsel %vm4376_vm13, %v2474_v41, 0 }
 0x2eb   : > { %2726 = vmatpush1.bf16.msra.mxu1 %v3988_v61  ;;  %v2470_v6 = vsel %vm4288_vm7, 0, %v2466_v4  ;;  %v2480_v8 = vsel %vm4376_vm13, %v2476_v24, 0 }
 0x2ec   : > { %2727 = vmatprep.subr.bf16.mxu1 %v4021_v5  ;;  %v2472_v9 = vsel %vm4297_vm8, %v2470_v6, 0  ;;  %v2482_v32 = vsel %vm4420_vm14, %v2480_v8, 0 }
 0x2ed   : > { %3473 = vmatprep.mubr.msk.bf16.mxu1 %vm2604_vm15, %v2472_v9 }
 0x2ef   : > { %2728 = vmatpush1.bf16.msra.mxu1 %v3989_v7 }
 0x2f0   : > { %2729 = vmatprep.subr.bf16.mxu1 %v4021_v5 }
 0x2f3   : > { %2730 = vmatpush1.bf16.msra.mxu1 %v3990_v10 }
 0x2f4   : > { %2731 = vmatprep.subr.bf16.mxu1 %v4021_v5 }
 0x2f7   : > { %2732 = vmatpush1.bf16.msra.mxu1 %v3991_v11 }
 0x2f8   : > { %2733 = vmatprep.subr.bf16.mxu1 %v4021_v5 }
 0x2fb   : > { %2734 = vmatpush1.bf16.msra.mxu1 %v3992_v13 }
 0x2fc   : > { %2735 = vmatprep.subr.bf16.mxu1 %v4021_v5 }
 0x2ff   : > { %2736 = vmatpush1.bf16.msra.mxu1 %v3993_v23 }
 0x300   : > { %2737 = vmatprep.subr.bf16.mxu1 %v4021_v5 }
 0x303   : > { %2738 = vmatpush1.bf16.msra.mxu1 %v3994_v14 }
 0x304   : > { %2739 = vmatprep.subr.bf16.mxu1 %v4021_v5 }
 0x307   : > { %2740 = vmatpush1.bf16.msra.mxu1 %v3995_v15 }
 0x308   : > { %2741 = vmatprep.subr.bf16.mxu1 %v4021_v5 }
 0x30b   : > { %2742 = vmatpush1.bf16.msra.mxu1 %v3996_v16 }
 0x30c   : > { %2743 = vmatprep.subr.bf16.mxu1 %v4021_v5 }
 0x30f   : > { %2744 = vmatpush1.bf16.msra.mxu1 %v3997_v18 }
 0x310   : > { %2745 = vmatprep.subr.bf16.mxu1 %v4021_v5 }
 0x313   : > { %2746 = vmatpush1.bf16.msra.mxu1 %v3998_v22 }
 0x314   : > { %2864 = vmatprep.subr.bf16.mxu1 %v4021_v5 }
 0x316   : > { %3474 = vmatmul.mubr.msk.bf16.vlgmr.msra.gmra.mrb[8].mxu1 %vm4297_vm8, %v2469_v29 }
 0x317   : > { %2865 = vmatpush1.bf16.msra.mxu1 %v3999_v3  ;;  %3511 = vmatprep.mubr.msk.bf16.mxu1 %vm2604_vm15, %v2482_v32 }
 0x318   : > { %2866 = vmatprep.subr.bf16.mxu1 %v4021_v5 }
 0x31b   : > { %2867 = vmatpush1.bf16.msra.mxu1 %v4000_v33 }
 0x31c   : > { %2868 = vmatprep.subr.bf16.mxu1 %v4021_v5 }
 0x31f   : > { %2869 = vmatpush1.bf16.msra.mxu1 %v4001_v62 }
 0x320   : > { %2870 = vmatprep.subr.bf16.mxu1 %v4021_v5 }
 0x323   : > { %2871 = vmatpush1.bf16.msra.mxu1 %v4002_v2 }
 0x324   : > { %2872 = vmatprep.subr.bf16.mxu1 %v4021_v5 }
 0x327   : > { %2873 = vmatpush1.bf16.msra.mxu1 %v4003_v28 }
 0x328   : > { %2874 = vmatprep.subr.bf16.mxu1 %v4021_v5 }
 0x32b   : > { %2875 = vmatpush1.bf16.msra.mxu1 %v4004_v21 }
 0x32c   : > { %2876 = vmatprep.subr.bf16.mxu1 %v4021_v5 }
 0x32f   : > { %2877 = vmatpush1.bf16.msra.mxu1 %v4005_v34 }
 0x330   : > { %2878 = vmatprep.subr.bf16.mxu1 %v4021_v5 }
 0x333   : > { %2879 = vmatpush1.bf16.msra.mxu1 %v4006_v35 }
 0x334   : > { %2880 = vmatprep.subr.bf16.mxu1 %v4021_v5 }
 0x337   : > { %2881 = vmatpush1.bf16.msra.mxu1 %v4007_v36 }
 0x338   : > { %2882 = vmatprep.subr.bf16.mxu1 %v4021_v5 }
 0x33b   : > { %2883 = vmatpush1.bf16.msra.mxu1 %v4008_v38 }
 0x33c   : > { %2884 = vmatprep.subr.bf16.mxu1 %v4021_v5 }
 0x33f   : > { %2885 = vmatpush1.bf16.msra.mxu1 %v4009_v39 }
 0x340   : > { %2886 = vmatprep.subr.bf16.mxu1 %v4021_v5 }
 0x343   : > { %2887 = vmatpush1.bf16.msra.mxu1 %v4010_v27 }
 0x346   : > { %3512 = vmatmul.mubr.msk.bf16.vlgmr.msra.gmra.mrb[8].mxu1 %vm4420_vm14, %v2479_v1 }
 0x419   : > { %v2898_v43 = vpop.f32.mrb[8].mxu1 }
 0x41a   : > { %v2914_v45 = vmul.f32 %v3513_v37, %v2898_v43  ;;  %v2900_v5 = vpop.f32.mrb[9].mxu1 }
 0x41b   : > { %v2901_v46 = vpop.f32.mrb[10].mxu1 }
 0x41c   : > { %v2915_v47 = vmul.f32 %v3513_v37, %v2901_v46  ;;  %v2903_v48 = vpop.f32.mrb[11].mxu1  ;;  %v2923_v25 = vadd.f32 %v3514_v44, %v2914_v45 }
 0x41e   : > { %v2925_v49 = vmax.f32 %v2923_v25, 0.0  ;;  %v2924_v50 = vadd.f32 %v3514_v44, %v2915_v47 }
 0x420   : > { %2927 = vxpose.xlu0.b32.start [1/2] (short) (narrow) %v2925_v49, 96  ;;  %v2926_v42 = vmax.f32 %v2924_v50, 0.0 }
 0x424   : > { %2928 = vxpose.xlu0.b32.end [2/2] (short) (narrow) %v2926_v42, 96 }
 0x4a0   : > { %v2943_v51 = vpop.trf.xlu0 }
 0x4a1   : > { %2960 = vst.msk [vmem:[%s359_s17] sm:$0xff] %vm2959_vm0, %v2943_v51 }
 0x4a4   : > { %v2944_v52 = vpop.trf.xlu0 }
 0x4a5   : > { %2961 = vst.msk [vmem:[%s359_s17 + $0x8] sm:$0xff] %vm2959_vm0, %v2944_v52 }
 0x4a8   : > { %v2945_v53 = vpop.trf.xlu0 }
 0x4a9   : > { %2962 = vst.msk [vmem:[%s359_s17 + $0x10] sm:$0xff] %vm2959_vm0, %v2945_v53 }
 0x4ac   : > { %v2946_v54 = vpop.trf.xlu0 }
 0x4ad   : > { %2963 = vst.msk [vmem:[%s359_s17 + $0x18] sm:$0xff] %vm2959_vm0, %v2946_v54 }
 0x4b0   : > { %v2947_v55 = vpop.trf.xlu0 }
 0x4b1   : > { %2964 = vst.msk [vmem:[%s359_s17 + $0x20] sm:$0xff] %vm2959_vm0, %v2947_v55 }
 0x4b4   : > { %v2948_v56 = vpop.trf.xlu0 }
 0x4b5   : > { %2965 = vst.msk [vmem:[%s359_s17 + $0x28] sm:$0xff] %vm2959_vm0, %v2948_v56 }
 0x4b8   : > { %v2949_v57 = vpop.trf.xlu0 }
 0x4b9   : > { %2966 = vst.msk [vmem:[%s359_s17 + $0x30] sm:$0xff] %vm2959_vm0, %v2949_v57 }
 0x4bc   : > { %v2950_v30 = vpop.trf.xlu0 }
 0x4bd   : > { %2967 = vst.msk [vmem:[%s359_s17 + $0x38] sm:$0xff] %vm2959_vm0, %v2950_v30 }
 0x4c0   : > { %v2951_v58 = vpop.trf.xlu0 }
 0x4c1   : > { %2968 = vst.msk [vmem:[%s359_s17 + $0x40] sm:$0xff] %vm2959_vm0, %v2951_v58 }
 0x4c4   : > { %v2952_v31 = vpop.trf.xlu0 }
 0x4c5   : > { %2969 = vst.msk [vmem:[%s359_s17 + $0x48] sm:$0xff] %vm2959_vm0, %v2952_v31 }
 0x4c8   : > { %v2953_v59 = vpop.trf.xlu0 }
 0x4c9   : > { %2970 = vst.msk [vmem:[%s359_s17 + $0x50] sm:$0xff] %vm2959_vm0, %v2953_v59 }
 0x4cc   : > { %v2954_v60 = vpop.trf.xlu0 }
 0x4cd   : > { %2971 = vst.msk [vmem:[%s359_s17 + $0x58] sm:$0xff] %vm2959_vm0, %v2954_v60 }
 0x4ce PF: > { %s20_s13 = sadd.s32 1, %s4017_s13  }
 0x4cf   : > { %p17_p4 = scmp.ge.s32.totalorder %s20_s13, 4  }
 0x4d1   :  { %19 = sbr.rel (!%p17_p4) target bundleno = 1 (0x1), region = 96 }

</bundles_post_ra>
